<compile_context>
chip_gen: v7x
topology: tpu7x:2x2x1
jax: 0.10.0
libtpu: 0.0.40
codegen_flags: <defaults>
</compile_context>

<pallas_src>
import jax
import jax.numpy as jnp
from jax.experimental import pallas as pl
from jax.experimental.pallas import tpu as pltpu

C_LEVEL = 3.0   # c_max
Q_LEVEL = 2.0   # quantization level


def _clamp_quant(v):
    # torch.clamp(x, 0, C) then Quantization_(x, Q) = floor(x*Q)/Q
    v = jnp.clip(v, 0.0, C_LEVEL)
    return jnp.floor(v * Q_LEVEL) / Q_LEVEL


def _loss_elems(v):
    # Elementwise |x - seq_val| of CalculateLoss(q_level=Q_LEVEL, c_max=C_LEVEL).
    q = Q_LEVEL
    c_max = C_LEVEL
    safe_zero = v <= 0.0
    safe_one = v >= c_max + 0.5 / q
    x_scaled = v * q
    # torch.round and jnp.round both round half-to-even
    k = 2.0 * jnp.round(x_scaled - 0.5 - 1e-05) + 1.0
    seq_val = k * 0.5 / q
    in_first = (v >= 0.0) & (v <= 1.0 / q)
    seq_val = jnp.where(in_first, 0.0, seq_val)
    seq_val = jnp.where(safe_zero, v, seq_val)
    seq_val = jnp.where(safe_one, v, seq_val)
    vv = jnp.where(in_first, 0.5 * v, v)
    return jnp.abs(vv - seq_val)


def _loss_partial(v):
    # Per-sample partial: reduce only over the feature (sublane) axis.
    # v: (F, TILE_B) -> (1, TILE_B)
    return jnp.sum(_loss_elems(v), axis=0, keepdims=True)


def mlp_kernel(xT_ref, w1_ref, b1_ref, w2_ref, b2_ref, w3t_ref, b3_ref,
               out_ref, yp_ref):
    # ---- layer 1: clamp -> quant -> fc1 (MXU) -> per-sample loss partial ----
    xq = _clamp_quant(xT_ref[...])                                        # (132, TB)
    h1 = jnp.dot(w1_ref[...], xq,
                 preferred_element_type=jnp.float32) + b1_ref[...]        # (128, TB)
    yp = _loss_partial(h1)                                                # (1, TB)

    # ---- layer 2 ----
    h1q = _clamp_quant(h1)
    h2 = jnp.dot(w2_ref[...], h1q,
                 preferred_element_type=jnp.float32) + b2_ref[...]        # (32, TB)
    yp = yp + _loss_partial(h2)

    # ---- layer 3 (out_features == 1): VPU mul + sublane reduce, no MXU pass ----
    h2q = _clamp_quant(h2)
    h3 = jnp.sum(h2q * w3t_ref[...], axis=0, keepdims=True) + b3_ref[...]  # (1, TB)
    yp = yp + _loss_partial(h3)

    out_ref[...] = jax.nn.sigmoid(h3)      # lane-dense (1, TB)
    yp_ref[...] = yp                       # lane-dense (1, TB) per-sample loss


def _pick_tile_b(batch):
    # Lane-axis tile: multiple of 128 (or the full batch). Cap at 4096 so the
    # double-buffered x tile stays far inside v7x's default scoped VMEM.
    for t in (4096, 2048, 1024, 512, 256, 128):
        if batch % t == 0:
            return t
    return batch   # small / ragged batch: single resident tile


def mlp_forward(x, w1, b1, w2, b2, w3, b3, *, tile_b=None):
    """x: (B, 132). w_i / b_i in PyTorch nn.Linear convention (out, in) / (out,).

    Returns (sigmoid(fc3(...)), total activation loss) exactly like MLP.forward.
    """
    B, F = x.shape
    if tile_b is None:
        tile_b = _pick_tile_b(B)
    assert B % tile_b == 0
    grid = (B // tile_b,)

    # Feature-major activations. Callers that can produce x already transposed
    # should do so and skip this extra HBM pass.
    xT = x.T                                     # (132, B)

    w1p, b1p = w1, b1.reshape(-1, 1)             # (128, 132), (128, 1)
    w2p, b2p = w2, b2.reshape(-1, 1)             # (32, 128),  (32, 1)
    w3p, b3p = w3.T, b3.reshape(1, 1)            # (32, 1),    (1, 1)

    def full(arr):
        # whole-array VMEM-resident block; constant index => DMA'd once.
        return pl.BlockSpec(arr.shape, lambda i: (0,) * arr.ndim)

    out_t, y_part = pl.pallas_call(
        mlp_kernel,
        grid=grid,
        in_specs=[
            pl.BlockSpec((F, tile_b), lambda i: (0, i)),   # streamed x tile
            full(w1p), full(b1p), full(w2p), full(b2p), full(w3p), full(b3p),
        ],
        out_specs=(
            pl.BlockSpec((1, tile_b), lambda i: (0, i)),   # sigmoid output
            pl.BlockSpec((1, tile_b), lambda i: (0, i)),   # per-sample loss partials
        ),
        out_shape=(
            jax.ShapeDtypeStruct((1, B), jnp.float32),
            jax.ShapeDtypeStruct((1, B), jnp.float32),
        ),
        compiler_params=pltpu.CompilerParams(
            dimension_semantics=("parallel",)),            # v7x: 2 TCs share the grid
    )(xT, w1p, b1p, w2p, b2p, w3p, b3p)

    out = out_t.reshape(B, 1)
    y = jnp.sum(y_part)                # final scalar reduce outside the kernel
    return out, y


_HIGH = jax.lax.Precision.HIGHEST


def mlp_reference(x, w1, b1, w2, b2, w3, b3):
    """Pure-JAX reference mirroring the PyTorch forward exactly."""
    h = jnp.dot(_clamp_quant(x), w1.T, precision=_HIGH) + b1
    y1 = jnp.sum(_loss_elems(h))
    h = jnp.dot(_clamp_quant(h), w2.T, precision=_HIGH) + b2
    y2 = jnp.sum(_loss_elems(h))
    h = jnp.dot(_clamp_quant(h), w3.T, precision=_HIGH) + b3
    y3 = jnp.sum(_loss_elems(h))
    return jax.nn.sigmoid(h), y1 + y2 + y3


def init_params(key, input_size=132, hidden_size=128):
    ks = jax.random.split(key, 6)

    def linear(kw, kb, fan_in, fan_out):
        bound = 1.0 / jnp.sqrt(fan_in)
        w = jax.random.uniform(kw, (fan_out, fan_in), jnp.float32, -bound, bound)
        b = jax.random.uniform(kb, (fan_out,), jnp.float32, -bound, bound)
        return w, b

    w1, b1 = linear(ks[0], ks[1], input_size, hidden_size)
    w2, b2 = linear(ks[2], ks[3], hidden_size, 32)
    w3, b3 = linear(ks[4], ks[5], 32, 1)
    return w1, b1, w2, b2, w3, b3


if __name__ == "__main__":
    key = jax.random.PRNGKey(0)
    kx, kp = jax.random.split(key)

    INPUT = 132
    params = init_params(kp, input_size=INPUT, hidden_size=128)

    # --- small single-tile case (B=8 -> one grid step), checked vs reference ---
    B = 8
    x = jax.random.uniform(kx, (B, INPUT), jnp.float32, minval=-1.0, maxval=4.0)
    out, y = mlp_forward(x, *params)
    out = jax.block_until_ready(out)
    y = jax.block_until_ready(y)

    ref_out, ref_y = mlp_reference(x, *params)
    assert out.shape == (B, 1)
    assert jnp.allclose(out, ref_out, atol=1e-5, rtol=1e-5), "output mismatch"
    assert jnp.allclose(y, ref_y, atol=1e-3, rtol=1e-4), "loss mismatch"

    # --- multi-tile case (B=256, tile=128 -> 2 grid steps) exercising the
    #     streaming/parallel batch grid; must agree with the single-tile run ---
    xb = jax.random.uniform(jax.random.PRNGKey(1), (256, INPUT), jnp.float32,
                            minval=-1.0, maxval=4.0)
    out2, y2 = mlp_forward(xb, *params, tile_b=128)   # grid = (2,)
    out1, y1 = mlp_forward(xb, *params, tile_b=256)   # grid = (1,)
    out2 = jax.block_until_ready(out2)
    y2 = jax.block_until_ready(y2)
    assert jnp.allclose(out2, out1, atol=1e-6), "tiling inconsistency (out)"
    assert jnp.allclose(y2, y1, atol=1e-4, rtol=1e-6), "tiling inconsistency (loss)"

    _, ref_yb = mlp_reference(xb, *params)
    assert jnp.allclose(y2, ref_yb, rtol=1e-2, atol=1e-2), "loss mismatch (B=256)"

    print("KERNEL_OK")
</pallas_src>

<mosaic_0001>
module attributes {stable_mosaic.version = 11 : i64} {
  func.func @mlp_kernel(%arg0: i32, %arg1: memref<132x8xf32, #tpu.memory_space<vmem>>, %arg2: memref<128x132xf32, #tpu.memory_space<vmem>>, %arg3: memref<128x1xf32, #tpu.memory_space<vmem>>, %arg4: memref<32x128xf32, #tpu.memory_space<vmem>>, %arg5: memref<32x1xf32, #tpu.memory_space<vmem>>, %arg6: memref<32x1xf32, #tpu.memory_space<vmem>>, %arg7: memref<1x1xf32, #tpu.memory_space<vmem>>, %arg8: memref<1x8xf32, #tpu.memory_space<vmem>>, %arg9: memref<1x8xf32, #tpu.memory_space<vmem>>) attributes {dimension_semantics = [#tpu.dimension_semantics<parallel>], iteration_bounds = array<i64: 1>, scalar_prefetch = 0 : i64, scratch_operands = 0 : i64, tpu.core_type = #tpu.core_type<tc>, window_params = [{transform_indices = @transform_0, window_bounds = array<i64: 132, 8>}, {pipeline_mode = #tpu.pipeline_mode<synchronous>, transform_indices = @transform_1, window_bounds = array<i64: 128, 132>}, {pipeline_mode = #tpu.pipeline_mode<synchronous>, transform_indices = @transform_2, window_bounds = array<i64: 128, 1>}, {pipeline_mode = #tpu.pipeline_mode<synchronous>, transform_indices = @transform_3, window_bounds = array<i64: 32, 128>}, {pipeline_mode = #tpu.pipeline_mode<synchronous>, transform_indices = @transform_4, window_bounds = array<i64: 32, 1>}, {pipeline_mode = #tpu.pipeline_mode<synchronous>, transform_indices = @transform_5, window_bounds = array<i64: 32, 1>}, {pipeline_mode = #tpu.pipeline_mode<synchronous>, transform_indices = @transform_6, window_bounds = array<i64: 1, 1>}, {transform_indices = @transform_7, window_bounds = array<i64: 1, 8>}, {transform_indices = @transform_8, window_bounds = array<i64: 1, 8>}]} {
    %c0 = arith.constant 0 : index
    %c0_0 = arith.constant 0 : index
    %0 = vector.load %arg1[%c0, %c0_0] : memref<132x8xf32, #tpu.memory_space<vmem>>, vector<132x8xf32>
    %cst = arith.constant 0.000000e+00 : f32
    %cst_1 = arith.constant 3.000000e+00 : f32
    %1 = vector.broadcast %cst : f32 to vector<132x8xf32>
    %2 = arith.maximumf %1, %0 : vector<132x8xf32>
    %3 = vector.broadcast %cst_1 : f32 to vector<132x8xf32>
    %4 = arith.minimumf %3, %2 : vector<132x8xf32>
    %cst_2 = arith.constant 2.000000e+00 : f32
    %5 = vector.broadcast %cst_2 : f32 to vector<132x8xf32>
    %6 = arith.mulf %4, %5 : vector<132x8xf32>
    %7 = math.floor %6 : vector<132x8xf32>
    %cst_3 = arith.constant 2.000000e+00 : f32
    %8 = vector.broadcast %cst_3 : f32 to vector<132x8xf32>
    %9 = arith.divf %7, %8 : vector<132x8xf32>
    %c0_4 = arith.constant 0 : index
    %c0_5 = arith.constant 0 : index
    %10 = vector.load %arg2[%c0_4, %c0_5] : memref<128x132xf32, #tpu.memory_space<vmem>>, vector<128x132xf32>
    %cst_6 = arith.constant dense<0.000000e+00> : vector<128x8xf32>
    %11 = tpu.matmul %10, %9, %cst_6 {dimension_numbers = #tpu.dot_dimension_numbers<[1], [0], [0], [1], [0, 0, 1, 1], [], []>} : vector<128x132xf32>, vector<132x8xf32>, vector<128x8xf32> -> vector<128x8xf32>
    %c0_7 = arith.constant 0 : index
    %c0_8 = arith.constant 0 : index
    %12 = vector.load %arg3[%c0_7, %c0_8] : memref<128x1xf32, #tpu.memory_space<vmem>>, vector<128x1xf32>
    %13 = vector.broadcast %12 : vector<128x1xf32> to vector<128x8xf32>
    %14 = arith.addf %11, %13 : vector<128x8xf32>
    %cst_9 = arith.constant 0.000000e+00 : f32
    %15 = vector.broadcast %cst_9 : f32 to vector<128x8xf32>
    %16 = arith.cmpf ole, %14, %15 : vector<128x8xf32>
    %cst_10 = arith.constant 3.250000e+00 : f32
    %17 = vector.broadcast %cst_10 : f32 to vector<128x8xf32>
    %18 = arith.cmpf oge, %14, %17 : vector<128x8xf32>
    %cst_11 = arith.constant 2.000000e+00 : f32
    %19 = vector.broadcast %cst_11 : f32 to vector<128x8xf32>
    %20 = arith.mulf %14, %19 : vector<128x8xf32>
    %cst_12 = arith.constant 5.000000e-01 : f32
    %21 = vector.broadcast %cst_12 : f32 to vector<128x8xf32>
    %22 = arith.subf %20, %21 : vector<128x8xf32>
    %cst_13 = arith.constant 9.99999974E-6 : f32
    %23 = vector.broadcast %cst_13 : f32 to vector<128x8xf32>
    %24 = arith.subf %22, %23 : vector<128x8xf32>
    %25 = math.roundeven %24 : vector<128x8xf32>
    %cst_14 = arith.constant 2.000000e+00 : f32
    %26 = vector.broadcast %cst_14 : f32 to vector<128x8xf32>
    %27 = arith.mulf %26, %25 : vector<128x8xf32>
    %cst_15 = arith.constant 1.000000e+00 : f32
    %28 = vector.broadcast %cst_15 : f32 to vector<128x8xf32>
    %29 = arith.addf %27, %28 : vector<128x8xf32>
    %cst_16 = arith.constant 5.000000e-01 : f32
    %30 = vector.broadcast %cst_16 : f32 to vector<128x8xf32>
    %31 = arith.mulf %29, %30 : vector<128x8xf32>
    %cst_17 = arith.constant 2.000000e+00 : f32
    %32 = vector.broadcast %cst_17 : f32 to vector<128x8xf32>
    %33 = arith.divf %31, %32 : vector<128x8xf32>
    %cst_18 = arith.constant 0.000000e+00 : f32
    %34 = vector.broadcast %cst_18 : f32 to vector<128x8xf32>
    %35 = arith.cmpf oge, %14, %34 : vector<128x8xf32>
    %cst_19 = arith.constant 5.000000e-01 : f32
    %36 = vector.broadcast %cst_19 : f32 to vector<128x8xf32>
    %37 = arith.cmpf ole, %14, %36 : vector<128x8xf32>
    %38 = arith.andi %35, %37 : vector<128x8xi1>
    %cst_20 = arith.constant 0.000000e+00 : f32
    %39 = vector.broadcast %cst_20 : f32 to vector<128x8xf32>
    %40 = arith.select %38, %39, %33 : vector<128x8xi1>, vector<128x8xf32>
    %41 = arith.select %16, %14, %40 : vector<128x8xi1>, vector<128x8xf32>
    %42 = arith.select %18, %14, %41 : vector<128x8xi1>, vector<128x8xf32>
    %cst_21 = arith.constant 5.000000e-01 : f32
    %43 = vector.broadcast %cst_21 : f32 to vector<128x8xf32>
    %44 = arith.mulf %43, %14 : vector<128x8xf32>
    %45 = arith.select %38, %44, %14 : vector<128x8xi1>, vector<128x8xf32>
    %46 = arith.subf %45, %42 : vector<128x8xf32>
    %47 = math.absf %46 : vector<128x8xf32>
    %cst_22 = arith.constant dense<0.000000e+00> : vector<8xf32>
    %48 = vector.multi_reduction <add>, %47, %cst_22 [0] : vector<128x8xf32> to vector<8xf32>
    %49 = vector.shape_cast %48 : vector<8xf32> to vector<1x8xf32>
    %cst_23 = arith.constant 0.000000e+00 : f32
    %cst_24 = arith.constant 3.000000e+00 : f32
    %50 = vector.broadcast %cst_23 : f32 to vector<128x8xf32>
    %51 = arith.maximumf %50, %14 : vector<128x8xf32>
    %52 = vector.broadcast %cst_24 : f32 to vector<128x8xf32>
    %53 = arith.minimumf %52, %51 : vector<128x8xf32>
    %cst_25 = arith.constant 2.000000e+00 : f32
    %54 = vector.broadcast %cst_25 : f32 to vector<128x8xf32>
    %55 = arith.mulf %53, %54 : vector<128x8xf32>
    %56 = math.floor %55 : vector<128x8xf32>
    %cst_26 = arith.constant 2.000000e+00 : f32
    %57 = vector.broadcast %cst_26 : f32 to vector<128x8xf32>
    %58 = arith.divf %56, %57 : vector<128x8xf32>
    %c0_27 = arith.constant 0 : index
    %c0_28 = arith.constant 0 : index
    %59 = vector.load %arg4[%c0_27, %c0_28] : memref<32x128xf32, #tpu.memory_space<vmem>>, vector<32x128xf32>
    %cst_29 = arith.constant dense<0.000000e+00> : vector<32x8xf32>
    %60 = tpu.matmul %59, %58, %cst_29 {dimension_numbers = #tpu.dot_dimension_numbers<[1], [0], [0], [1], [0, 0, 1, 1], [], []>} : vector<32x128xf32>, vector<128x8xf32>, vector<32x8xf32> -> vector<32x8xf32>
    %c0_30 = arith.constant 0 : index
    %c0_31 = arith.constant 0 : index
    %61 = vector.load %arg5[%c0_30, %c0_31] : memref<32x1xf32, #tpu.memory_space<vmem>>, vector<32x1xf32>
    %62 = vector.broadcast %61 : vector<32x1xf32> to vector<32x8xf32>
    %63 = arith.addf %60, %62 : vector<32x8xf32>
    %cst_32 = arith.constant 0.000000e+00 : f32
    %64 = vector.broadcast %cst_32 : f32 to vector<32x8xf32>
    %65 = arith.cmpf ole, %63, %64 : vector<32x8xf32>
    %cst_33 = arith.constant 3.250000e+00 : f32
    %66 = vector.broadcast %cst_33 : f32 to vector<32x8xf32>
    %67 = arith.cmpf oge, %63, %66 : vector<32x8xf32>
    %cst_34 = arith.constant 2.000000e+00 : f32
    %68 = vector.broadcast %cst_34 : f32 to vector<32x8xf32>
    %69 = arith.mulf %63, %68 : vector<32x8xf32>
    %cst_35 = arith.constant 5.000000e-01 : f32
    %70 = vector.broadcast %cst_35 : f32 to vector<32x8xf32>
    %71 = arith.subf %69, %70 : vector<32x8xf32>
    %cst_36 = arith.constant 9.99999974E-6 : f32
    %72 = vector.broadcast %cst_36 : f32 to vector<32x8xf32>
    %73 = arith.subf %71, %72 : vector<32x8xf32>
    %74 = math.roundeven %73 : vector<32x8xf32>
    %cst_37 = arith.constant 2.000000e+00 : f32
    %75 = vector.broadcast %cst_37 : f32 to vector<32x8xf32>
    %76 = arith.mulf %75, %74 : vector<32x8xf32>
    %cst_38 = arith.constant 1.000000e+00 : f32
    %77 = vector.broadcast %cst_38 : f32 to vector<32x8xf32>
    %78 = arith.addf %76, %77 : vector<32x8xf32>
    %cst_39 = arith.constant 5.000000e-01 : f32
    %79 = vector.broadcast %cst_39 : f32 to vector<32x8xf32>
    %80 = arith.mulf %78, %79 : vector<32x8xf32>
    %cst_40 = arith.constant 2.000000e+00 : f32
    %81 = vector.broadcast %cst_40 : f32 to vector<32x8xf32>
    %82 = arith.divf %80, %81 : vector<32x8xf32>
    %cst_41 = arith.constant 0.000000e+00 : f32
    %83 = vector.broadcast %cst_41 : f32 to vector<32x8xf32>
    %84 = arith.cmpf oge, %63, %83 : vector<32x8xf32>
    %cst_42 = arith.constant 5.000000e-01 : f32
    %85 = vector.broadcast %cst_42 : f32 to vector<32x8xf32>
    %86 = arith.cmpf ole, %63, %85 : vector<32x8xf32>
    %87 = arith.andi %84, %86 : vector<32x8xi1>
    %cst_43 = arith.constant 0.000000e+00 : f32
    %88 = vector.broadcast %cst_43 : f32 to vector<32x8xf32>
    %89 = arith.select %87, %88, %82 : vector<32x8xi1>, vector<32x8xf32>
    %90 = arith.select %65, %63, %89 : vector<32x8xi1>, vector<32x8xf32>
    %91 = arith.select %67, %63, %90 : vector<32x8xi1>, vector<32x8xf32>
    %cst_44 = arith.constant 5.000000e-01 : f32
    %92 = vector.broadcast %cst_44 : f32 to vector<32x8xf32>
    %93 = arith.mulf %92, %63 : vector<32x8xf32>
    %94 = arith.select %87, %93, %63 : vector<32x8xi1>, vector<32x8xf32>
    %95 = arith.subf %94, %91 : vector<32x8xf32>
    %96 = math.absf %95 : vector<32x8xf32>
    %cst_45 = arith.constant dense<0.000000e+00> : vector<8xf32>
    %97 = vector.multi_reduction <add>, %96, %cst_45 [0] : vector<32x8xf32> to vector<8xf32>
    %98 = vector.shape_cast %97 : vector<8xf32> to vector<1x8xf32>
    %99 = arith.addf %49, %98 : vector<1x8xf32>
    %cst_46 = arith.constant 0.000000e+00 : f32
    %cst_47 = arith.constant 3.000000e+00 : f32
    %100 = vector.broadcast %cst_46 : f32 to vector<32x8xf32>
    %101 = arith.maximumf %100, %63 : vector<32x8xf32>
    %102 = vector.broadcast %cst_47 : f32 to vector<32x8xf32>
    %103 = arith.minimumf %102, %101 : vector<32x8xf32>
    %cst_48 = arith.constant 2.000000e+00 : f32
    %104 = vector.broadcast %cst_48 : f32 to vector<32x8xf32>
    %105 = arith.mulf %103, %104 : vector<32x8xf32>
    %106 = math.floor %105 : vector<32x8xf32>
    %cst_49 = arith.constant 2.000000e+00 : f32
    %107 = vector.broadcast %cst_49 : f32 to vector<32x8xf32>
    %108 = arith.divf %106, %107 : vector<32x8xf32>
    %c0_50 = arith.constant 0 : index
    %c0_51 = arith.constant 0 : index
    %109 = vector.load %arg6[%c0_50, %c0_51] : memref<32x1xf32, #tpu.memory_space<vmem>>, vector<32x1xf32>
    %110 = vector.broadcast %109 : vector<32x1xf32> to vector<32x8xf32>
    %111 = arith.mulf %108, %110 : vector<32x8xf32>
    %cst_52 = arith.constant dense<0.000000e+00> : vector<8xf32>
    %112 = vector.multi_reduction <add>, %111, %cst_52 [0] : vector<32x8xf32> to vector<8xf32>
    %113 = vector.shape_cast %112 : vector<8xf32> to vector<1x8xf32>
    %c0_53 = arith.constant 0 : index
    %c0_54 = arith.constant 0 : index
    %114 = vector.load %arg7[%c0_53, %c0_54] : memref<1x1xf32, #tpu.memory_space<vmem>>, vector<1x1xf32>
    %115 = vector.broadcast %114 : vector<1x1xf32> to vector<1x8xf32>
    %116 = arith.addf %113, %115 : vector<1x8xf32>
    %cst_55 = arith.constant 0.000000e+00 : f32
    %117 = vector.broadcast %cst_55 : f32 to vector<1x8xf32>
    %118 = arith.cmpf ole, %116, %117 : vector<1x8xf32>
    %cst_56 = arith.constant 3.250000e+00 : f32
    %119 = vector.broadcast %cst_56 : f32 to vector<1x8xf32>
    %120 = arith.cmpf oge, %116, %119 : vector<1x8xf32>
    %cst_57 = arith.constant 2.000000e+00 : f32
    %121 = vector.broadcast %cst_57 : f32 to vector<1x8xf32>
    %122 = arith.mulf %116, %121 : vector<1x8xf32>
    %cst_58 = arith.constant 5.000000e-01 : f32
    %123 = vector.broadcast %cst_58 : f32 to vector<1x8xf32>
    %124 = arith.subf %122, %123 : vector<1x8xf32>
    %cst_59 = arith.constant 9.99999974E-6 : f32
    %125 = vector.broadcast %cst_59 : f32 to vector<1x8xf32>
    %126 = arith.subf %124, %125 : vector<1x8xf32>
    %127 = math.roundeven %126 : vector<1x8xf32>
    %cst_60 = arith.constant 2.000000e+00 : f32
    %128 = vector.broadcast %cst_60 : f32 to vector<1x8xf32>
    %129 = arith.mulf %128, %127 : vector<1x8xf32>
    %cst_61 = arith.constant 1.000000e+00 : f32
    %130 = vector.broadcast %cst_61 : f32 to vector<1x8xf32>
    %131 = arith.addf %129, %130 : vector<1x8xf32>
    %cst_62 = arith.constant 5.000000e-01 : f32
    %132 = vector.broadcast %cst_62 : f32 to vector<1x8xf32>
    %133 = arith.mulf %131, %132 : vector<1x8xf32>
    %cst_63 = arith.constant 2.000000e+00 : f32
    %134 = vector.broadcast %cst_63 : f32 to vector<1x8xf32>
    %135 = arith.divf %133, %134 : vector<1x8xf32>
    %cst_64 = arith.constant 0.000000e+00 : f32
    %136 = vector.broadcast %cst_64 : f32 to vector<1x8xf32>
    %137 = arith.cmpf oge, %116, %136 : vector<1x8xf32>
    %cst_65 = arith.constant 5.000000e-01 : f32
    %138 = vector.broadcast %cst_65 : f32 to vector<1x8xf32>
    %139 = arith.cmpf ole, %116, %138 : vector<1x8xf32>
    %140 = arith.andi %137, %139 : vector<1x8xi1>
    %cst_66 = arith.constant 0.000000e+00 : f32
    %141 = vector.broadcast %cst_66 : f32 to vector<1x8xf32>
    %142 = arith.select %140, %141, %135 : vector<1x8xi1>, vector<1x8xf32>
    %143 = arith.select %118, %116, %142 : vector<1x8xi1>, vector<1x8xf32>
    %144 = arith.select %120, %116, %143 : vector<1x8xi1>, vector<1x8xf32>
    %cst_67 = arith.constant 5.000000e-01 : f32
    %145 = vector.broadcast %cst_67 : f32 to vector<1x8xf32>
    %146 = arith.mulf %145, %116 : vector<1x8xf32>
    %147 = arith.select %140, %146, %116 : vector<1x8xi1>, vector<1x8xf32>
    %148 = arith.subf %147, %144 : vector<1x8xf32>
    %149 = math.absf %148 : vector<1x8xf32>
    %cst_68 = arith.constant dense<0.000000e+00> : vector<8xf32>
    %150 = vector.multi_reduction <add>, %149, %cst_68 [0] : vector<1x8xf32> to vector<8xf32>
    %151 = vector.shape_cast %150 : vector<8xf32> to vector<1x8xf32>
    %152 = arith.addf %99, %151 : vector<1x8xf32>
    %153 = arith.negf %116 : vector<1x8xf32>
    %154 = math.exp %153 : vector<1x8xf32>
    %cst_69 = arith.constant 1.000000e+00 : f32
    %155 = vector.broadcast %cst_69 : f32 to vector<1x8xf32>
    %156 = arith.addf %155, %154 : vector<1x8xf32>
    %157 = arith.divf %155, %156 : vector<1x8xf32>
    %c0_70 = arith.constant 0 : index
    %c0_71 = arith.constant 0 : index
    %158 = vector.load %arg8[%c0_70, %c0_71] : memref<1x8xf32, #tpu.memory_space<vmem>>, vector<1x8xf32>
    tpu.vector_store %arg8[%c0_70, %c0_71], %157 {strides = array<i32>} : memref<1x8xf32, #tpu.memory_space<vmem>>, vector<1x8xf32>,
    %c0_72 = arith.constant 0 : index
    %c0_73 = arith.constant 0 : index
    %159 = vector.load %arg9[%c0_72, %c0_73] : memref<1x8xf32, #tpu.memory_space<vmem>>, vector<1x8xf32>
    tpu.vector_store %arg9[%c0_72, %c0_73], %152 {strides = array<i32>} : memref<1x8xf32, #tpu.memory_space<vmem>>, vector<1x8xf32>,
    return
  }
  func.func @transform_0(%arg0: i32) -> (i32, i32) {
    %c0_i32 = arith.constant 0 : i32
    %c0_i32_0 = arith.constant 0 : i32
    return %c0_i32, %arg0 : i32, i32
  }
  func.func @transform_1(%arg0: i32) -> (i32, i32) {
    %c0_i32 = arith.constant 0 : i32
    %c0_i32_0 = arith.constant 0 : i32
    %c0_i32_1 = arith.constant 0 : i32
    return %c0_i32, %c0_i32_0 : i32, i32
  }
  func.func @transform_2(%arg0: i32) -> (i32, i32) {
    %c0_i32 = arith.constant 0 : i32
    %c0_i32_0 = arith.constant 0 : i32
    %c0_i32_1 = arith.constant 0 : i32
    return %c0_i32, %c0_i32_0 : i32, i32
  }
  func.func @transform_3(%arg0: i32) -> (i32, i32) {
    %c0_i32 = arith.constant 0 : i32
    %c0_i32_0 = arith.constant 0 : i32
    %c0_i32_1 = arith.constant 0 : i32
    return %c0_i32, %c0_i32_0 : i32, i32
  }
  func.func @transform_4(%arg0: i32) -> (i32, i32) {
    %c0_i32 = arith.constant 0 : i32
    %c0_i32_0 = arith.constant 0 : i32
    %c0_i32_1 = arith.constant 0 : i32
    return %c0_i32, %c0_i32_0 : i32, i32
  }
  func.func @transform_5(%arg0: i32) -> (i32, i32) {
    %c0_i32 = arith.constant 0 : i32
    %c0_i32_0 = arith.constant 0 : i32
    %c0_i32_1 = arith.constant 0 : i32
    return %c0_i32, %c0_i32_0 : i32, i32
  }
  func.func @transform_6(%arg0: i32) -> (i32, i32) {
    %c0_i32 = arith.constant 0 : i32
    %c0_i32_0 = arith.constant 0 : i32
    %c0_i32_1 = arith.constant 0 : i32
    return %c0_i32, %c0_i32_0 : i32, i32
  }
  func.func @transform_7(%arg0: i32) -> (i32, i32) {
    %c0_i32 = arith.constant 0 : i32
    %c0_i32_0 = arith.constant 0 : i32
    return %c0_i32, %arg0 : i32, i32
  }
  func.func @transform_8(%arg0: i32) -> (i32, i32) {
    %c0_i32 = arith.constant 0 : i32
    %c0_i32_0 = arith.constant 0 : i32
    return %c0_i32, %arg0 : i32, i32
  }
}

</mosaic_0001>

<bundles_post_ra>
// kernel: tpu_custom_call.1
= control target key start
LH: loop header
LB: loop body
LE: loop exit
PB: predicated region body
PF: predicated region fallthrough
CT: control target
= control target key end

     0   :  { %s2483_s0 = inlined_call_operand.vmem [shape: f32[132,8], index: 0, kind: input, shape index: {}]   ;;  %s2484_s1 = inlined_call_operand.vmem [shape: f32[128,132], index: 1, kind: input, shape index: {}]   ;;  %s2485_s2 = inlined_call_operand.vmem [shape: f32[128,1], index: 2, kind: input, shape index: {}]   ;;  %s2486_s3 = inlined_call_operand.vmem [shape: f32[32,128], index: 3, kind: input, shape index: {}]   ;;  %s2487_s4 = inlined_call_operand.vmem [shape: f32[32,1], index: 4, kind: input, shape index: {}]   ;;  %s2488_s5 = inlined_call_operand.vmem [shape: f32[32,1], index: 5, kind: input, shape index: {}]   ;;  %s2489_s6 = inlined_call_operand.<no memory space> [shape: f32[1,1], index: 6, kind: input, shape index: {}]   ;;  %s2490_s7 = inlined_call_operand.hbm [shape: f32[1,8], index: 7, kind: output, shape index: {0}]   ;;  %s2491_s8 = inlined_call_operand.hbm [shape: f32[1,8], index: 8, kind: output, shape index: {1}]  }
   0x1   :  { %v14_v0 = vstv %s2489_s6 }
   0x2   :  { %15 = vst [vmem:[#allocation2] sm:$0x1] %v14_v0 }
   0x3   :  { %16 = vsyncpa [#allocation4], 0  ;;  %v32_v1 = vld [vmem:[%s2483_s0] sm:$0xff]  ;;  %v33_v2 = vld [vmem:[%s2483_s0 + $0x8] sm:$0xff]  ;;  %v1491_v4 = vmov 0.0|0.0   ;;  %vm263_vm0 = vcmask 31744  }
   0x4   :  { %v34_v3 = vld [vmem:[%s2483_s0 + $0x10] sm:$0xff]  ;;  %1355 = vmatprep.subr.bf16.mxu0 %v1491_v4  ;;  %v49_v5 = vmax.f32 %v32_v1, 0.0  ;;  %v50_v6 = vmax.f32 %v33_v2, 0.0  ;;  %v35_v7 = vld [vmem:[%s2483_s0 + $0x18] sm:$0xff]  ;;  %v36_v9 = vld [vmem:[%s2483_s0 + $0x20] sm:$0xff] }
   0x5   :  { %v51_v8 = vmax.f32 %v34_v3, 0.0  ;;  %v37_v10 = vld [vmem:[%s2483_s0 + $0x28] sm:$0xff]  ;;  %v52_v11 = vmax.f32 %v35_v7, 0.0  ;;  %v53_v12 = vmax.f32 %v36_v9, 0.0  ;;  %v38_v14 = vld [vmem:[%s2483_s0 + $0x30] sm:$0xff]  ;;  %v39_v15 = vld [vmem:[%s2483_s0 + $0x38] sm:$0xff] }
   0x6   :  { %v54_v13 = vmax.f32 %v37_v10, 0.0  ;;  %v66_v16 = vmin.f32 %v49_v5, 3.0  ;;  %v67_v17 = vmin.f32 %v50_v6, 3.0  ;;  %v55_v19 = vmax.f32 %v38_v14, 0.0  ;;  %v40_v40 = vld [vmem:[%s2483_s0 + $0x40] sm:$0xff]  ;;  %v41_v41 = vld [vmem:[%s2483_s0 + $0x48] sm:$0xff] }
   0x7   :  { %v68_v18 = vmin.f32 %v51_v8, 3.0  ;;  %v69_v20 = vmin.f32 %v52_v11, 3.0  ;;  %v70_v21 = vmin.f32 %v53_v12, 3.0  ;;  %v56_v23 = vmax.f32 %v39_v15, 0.0  ;;  %v42_v45 = vld [vmem:[%s2483_s0 + $0x50] sm:$0xff]  ;;  %v43_v50 = vld [vmem:[%s2483_s0 + $0x58] sm:$0xff] }
   0x8   :  { %v71_v22 = vmin.f32 %v54_v13, 3.0  ;;  %v83_v24 = vmul.f32 2.0, %v66_v16  ;;  %v84_v25 = vmul.f32 2.0, %v67_v17  ;;  %v72_v27 = vmin.f32 %v55_v19, 3.0  ;;  %v44_v51 = vld [vmem:[%s2483_s0 + $0x60] sm:$0xff]  ;;  %v45_v56 = vld [vmem:[%s2483_s0 + $0x68] sm:$0xff] }
   0x9   :  { %v85_v26 = vmul.f32 2.0, %v68_v18  ;;  %v86_v28 = vmul.f32 2.0, %v69_v20  ;;  %v87_v29 = vmul.f32 2.0, %v70_v21  ;;  %v73_v31 = vmin.f32 %v56_v23, 3.0  ;;  %v46_v63 = vld [vmem:[%s2483_s0 + $0x70] sm:$0xff]  ;;  %v47_v5 = vld [vmem:[%s2483_s0 + $0x78] sm:$0xff] }
   0xa   :  { %v88_v30 = vmul.f32 2.0, %v71_v22  ;;  %v100_v32 = vfloor.f32 %v83_v24  ;;  %v101_v33 = vfloor.f32 %v84_v25  ;;  %v89_v35 = vmul.f32 2.0, %v72_v27  ;;  %v136_v23 = vld [vmem:[%s2484_s1 + $0x8] sm:$0xff] }
   0xb   :  { %v102_v34 = vfloor.f32 %v85_v26  ;;  %v103_v36 = vfloor.f32 %v86_v28  ;;  %v104_v37 = vfloor.f32 %v87_v29  ;;  %v90_v39 = vmul.f32 2.0, %v73_v31  ;;  %v48_v28 = vld [vmem:[%s2483_s0 + $0x80] sm:$0xf]  ;;  %1238 = vmatprep.mubr.msk.f32.mxu0 %vm263_vm0, %v136_v23 }
   0xc   :  { %v105_v38 = vfloor.f32 %v88_v30  ;;  %v118_v42 = vmul.f32 0.5, %v100_v32  ;;  %v119_v43 = vmul.f32 0.5, %v101_v33  ;;  %v106_v49 = vfloor.f32 %v89_v35  ;;  %v167_v29 = vld [vmem:[%s2485_s2] sm:$0xff]  ;;  %v169_v30 = vld [vmem:[%s2485_s2 + $0x10] sm:$0xff] }
   0xd   :  { %v120_v44 = vmul.f32 0.5, %v102_v34  ;;  %v121_v46 = vmul.f32 0.5, %v103_v36  ;;  %v122_v47 = vmul.f32 0.5, %v104_v37  ;;  %v107_v53 = vfloor.f32 %v90_v39 }
   0xe   :  { %v123_v48 = vmul.f32 0.5, %v105_v38  ;;  %v1356_v52 = vpack.c.bf16 %v119_v43, %v118_v42  ;;  %v57_v54 = vmax.f32 %v40_v40, 0.0  ;;  %v58_v55 = vmax.f32 %v41_v41, 0.0  ;;  %v168_v40 = vld [vmem:[%s2485_s2 + $0x8] sm:$0xff]  ;;  %v170_v41 = vld [vmem:[%s2485_s2 + $0x18] sm:$0xff] }
   0xf   :  { %v1359_v57 = vpack.c.bf16 %v121_v46, %v120_v44  ;;  %v59_v58 = vmax.f32 %v42_v45, 0.0  ;;  %v60_v61 = vmax.f32 %v43_v50, 0.0  ;;  %v61_v62 = vmax.f32 %v44_v51, 0.0 }
  0x10   :  { %1357 = vmatpush1.bf16.msra.mxu0 %v1356_v52  ;;  %v74_v59 = vmin.f32 %v57_v54, 3.0  ;;  %v75_v60 = vmin.f32 %v58_v55, 3.0  ;;  %v1362_v0 = vpack.c.bf16 %v123_v48, %v122_v47  ;;  %v124_v1 = vmul.f32 0.5, %v106_v49 }
  0x11   :  { %1358 = vmatprep.subr.bf16.mxu0 %v1491_v4  ;;  %v76_v2 = vmin.f32 %v59_v58, 3.0  ;;  %v62_v3 = vmax.f32 %v45_v56, 0.0  ;;  %v125_v6 = vmul.f32 0.5, %v107_v53  ;;  %v77_v9 = vmin.f32 %v60_v61, 3.0 }
  0x12   :  { %v91_v7 = vmul.f32 2.0, %v74_v59  ;;  %v92_v8 = vmul.f32 2.0, %v75_v60  ;;  %v78_v11 = vmin.f32 %v61_v62, 3.0  ;;  %v63_v13 = vmax.f32 %v46_v63, 0.0 }
  0x13   :  { %v93_v10 = vmul.f32 2.0, %v76_v2  ;;  %v79_v12 = vmin.f32 %v62_v3, 3.0  ;;  %v94_v16 = vmul.f32 2.0, %v77_v9  ;;  %v64_v17 = vmax.f32 %v47_v5, 0.0 }
  0x14   :  { %1360 = vmatpush1.bf16.msra.mxu0 %v1359_v57  ;;  %v108_v14 = vfloor.f32 %v91_v7  ;;  %v109_v15 = vfloor.f32 %v92_v8  ;;  %v1365_v18 = vpack.c.bf16 %v125_v6, %v124_v1  ;;  %v95_v20 = vmul.f32 2.0, %v78_v11 }
  0x15   :  { %1361 = vmatprep.subr.bf16.mxu0 %v1491_v4  ;;  %v110_v19 = vfloor.f32 %v93_v10  ;;  %v96_v21 = vmul.f32 2.0, %v79_v12  ;;  %v80_v22 = vmin.f32 %v63_v13, 3.0  ;;  %v111_v26 = vfloor.f32 %v94_v16 }
  0x16   :  { %v126_v24 = vmul.f32 0.5, %v108_v14  ;;  %v127_v25 = vmul.f32 0.5, %v109_v15  ;;  %v81_v27 = vmin.f32 %v64_v17, 3.0  ;;  %v112_v32 = vfloor.f32 %v95_v20 }
  0x17   :  { %v128_v31 = vmul.f32 0.5, %v110_v19  ;;  %v113_v33 = vfloor.f32 %v96_v21  ;;  %v97_v34 = vmul.f32 2.0, %v80_v22  ;;  %v1492_v35 = vmov 0  }
  0x18   :  { %1363 = vmatpush1.bf16.msra.mxu0 %v1362_v0  ;;  %1437 = vset.pattern.permute.xlu0 %v1492_v35  ;;  %v1368_v36 = vpack.c.bf16 %v127_v25, %v126_v24  ;;  %v129_v37 = vmul.f32 0.5, %v111_v26  ;;  %v98_v38 = vmul.f32 2.0, %v81_v27  ;;  %v65_v39 = vmax.f32 %v48_v28, 0.0 }
  0x19   :  { %1364 = vmatprep.subr.bf16.mxu0 %v1491_v4  ;;  %1438 = vset.pattern.permute.xlu1 %v1492_v35 }
  0x1a   :  { %185 = vperm.xlu0 %1437, %v167_v29   ;;  %195 = vperm.xlu1 %1438, %v169_v30  }
  0x1c   :  { %1366 = vmatpush1.bf16.msra.mxu0 %v1365_v18 }
  0x1d   :  { %1367 = vmatprep.subr.bf16.mxu0 %v1491_v4 }
  0x1e   :  { %17 = vsyncpa [#allocation6], 0  ;;  %v130_v42 = vmul.f32 0.5, %v112_v32  ;;  %v114_v43 = vfloor.f32 %v97_v34  ;;  %v1371_v44 = vpack.c.bf16 %v129_v37, %v128_v31  ;;  %v131_v45 = vmul.f32 0.5, %v113_v33  ;;  %190 = vperm.xlu0 %1437, %v168_v40   ;;  %v171_v48 = vld [vmem:[%s2485_s2 + $0x20] sm:$0xff]  ;;  %200 = vperm.xlu1 %1438, %v170_v41   ;;  %v172_v49 = vld [vmem:[%s2485_s2 + $0x28] sm:$0xff] }
  0x1f   :  { %v115_v46 = vfloor.f32 %v98_v38  ;;  %v82_v47 = vmin.f32 %v65_v39, 3.0  ;;  %v173_v54 = vld [vmem:[%s2485_s2 + $0x30] sm:$0xff]  ;;  %v174_v55 = vld [vmem:[%s2485_s2 + $0x38] sm:$0xff]  ;;  %v175_v58 = vld [vmem:[%s2485_s2 + $0x40] sm:$0xff]  ;;  %v1493_v61 = vmov 0.0   ;;  %vm312_vm1 = vcmask 1043456  }
  0x20   :  { %1369 = vmatpush1.bf16.msra.mxu0 %v1368_v36  ;;  %v1374_v50 = vpack.c.bf16 %v131_v45, %v130_v42  ;;  %v132_v51 = vmul.f32 0.5, %v114_v43  ;;  %v176_v59 = vld [vmem:[%s2485_s2 + $0x48] sm:$0xff]  ;;  %v177_v62 = vld [vmem:[%s2485_s2 + $0x50] sm:$0xff]  ;;  %v178_v63 = vld [vmem:[%s2485_s2 + $0x58] sm:$0xff]  ;;  %s1495_s11 = smov [#allocation3]  }
  0x21   :  { %1370 = vmatprep.subr.bf16.mxu0 %v1491_v4  ;;  %v133_v52 = vmul.f32 0.5, %v115_v46  ;;  %v99_v53 = vmul.f32 2.0, %v82_v47  ;;  %v138_v0 = vld [vmem:[%s2484_s1 + $0x18] sm:$0xff]  ;;  %v179_v1 = vld [vmem:[%s2485_s2 + $0x60] sm:$0xff]  ;;  %v137_v2 = vld [vmem:[%s2484_s1 + $0x10] sm:$0xff]  ;;  %s1215_s12 = sshll.u32 %s1495_s11, 4  ;;  %s2451_s12 = int_to_ptr.vmem [resolvable:$true] %s1215_s12 }
  0x22   :  { %205 = vperm.xlu0 %1437, %v171_v48   ;;  %210 = vperm.xlu1 %1438, %v172_v49   ;;  %v180_v3 = vld [vmem:[%s2485_s2 + $0x68] sm:$0xff]  ;;  %v181_v6 = vld [vmem:[%s2485_s2 + $0x70] sm:$0xff]  ;;  %v139_v7 = vld [vmem:[%s2484_s1 + $0x20] sm:$0xff] }
  0x23   :  { %v1377_v56 = vpack.c.bf16 %v133_v52, %v132_v51  ;;  %v116_v57 = vfloor.f32 %v99_v53  ;;  %v140_v5 = vld [vmem:[%s2484_s1 + $0x28] sm:$0xff]  ;;  %v182_v8 = vld [vmem:[%s2485_s2 + $0x78] sm:$0xff]  ;;  %v903_v10 = vld [vmem:[%s2487_s4] sm:$0xff] }
  0x24   :  { %1372 = vmatpush1.bf16.msra.mxu0 %v1371_v44  ;;  %v142_v9 = vld [vmem:[%s2484_s1 + $0x38] sm:$0xff]  ;;  %v141_v11 = vld [vmem:[%s2484_s1 + $0x30] sm:$0xff]  ;;  %v904_v12 = vld [vmem:[%s2487_s4 + $0x8] sm:$0xff] }
  0x25   :  { %1373 = vmatprep.subr.bf16.mxu0 %v1491_v4  ;;  %v134_v60 = vmul.f32 0.5, %v116_v57  ;;  %v144_v13 = vld [vmem:[%s2484_s1 + $0x48] sm:$0xff]  ;;  %v905_v14 = vld [vmem:[%s2487_s4 + $0x10] sm:$0xff]  ;;  %v143_v15 = vld [vmem:[%s2484_s1 + $0x40] sm:$0xff] }
  0x26   :  { %215 = vperm.xlu0 %1437, %v173_v54   ;;  %220 = vperm.xlu1 %1438, %v174_v55   ;;  %v906_v16 = vld [vmem:[%s2487_s4 + $0x18] sm:$0xff]  ;;  %v1126_v18 = vld [vmem:[%s2488_s5] sm:$0xff]  ;;  %v145_v19 = vld [vmem:[%s2484_s1 + $0x50] sm:$0xff] }
  0x27   :  { %v146_v17 = vld [vmem:[%s2484_s1 + $0x58] sm:$0xff]  ;;  %v1127_v20 = vld [vmem:[%s2488_s5 + $0x8] sm:$0xff]  ;;  %v1128_v22 = vld [vmem:[%s2488_s5 + $0x10] sm:$0xff] }
  0x28   :  { %1375 = vmatpush1.bf16.msra.mxu0 %v1374_v50  ;;  %v148_v21 = vld [vmem:[%s2484_s1 + $0x68] sm:$0xff]  ;;  %v147_v23 = vld [vmem:[%s2484_s1 + $0x60] sm:$0xff]  ;;  %v1129_v24 = vld [vmem:[%s2488_s5 + $0x18] sm:$0xff] }
  0x29   :  { %1376 = vmatprep.subr.bf16.mxu0 %v1491_v4  ;;  %v135_v4 = vld [vmem:[%s2484_s1] sm:$0xff]  ;;  %v150_v25 = vld [vmem:[%s2484_s1 + $0x78] sm:$0xff]  ;;  %v149_v27 = vld [vmem:[%s2484_s1 + $0x70] sm:$0xff] }
  0x2a   :  { %225 = vperm.xlu0 %1437, %v175_v58   ;;  %230 = vperm.xlu1 %1438, %v176_v59   ;;  %v1167_v26 = vld [vmem:[#allocation2] sm:$0x1]  ;;  %v152_v28 = vld [vmem:[%s2484_s1 + $0x88] sm:$0xff]  ;;  %v154_v30 = vld [vmem:[%s2484_s1 + $0x98] sm:$0xff] }
  0x2b   :  { %v151_v29 = vld [vmem:[%s2484_s1 + $0x80] sm:$0xff]  ;;  %v153_v31 = vld [vmem:[%s2484_s1 + $0x90] sm:$0xff]  ;;  %v156_v32 = vld [vmem:[%s2484_s1 + $0xa8] sm:$0xff] }
  0x2c   :  { %1378 = vmatpush1.bf16.msra.mxu0 %v1377_v56  ;;  %v155_v33 = vld [vmem:[%s2484_s1 + $0xa0] sm:$0xff]  ;;  %v158_v34 = vld [vmem:[%s2484_s1 + $0xb8] sm:$0xff]  ;;  %v157_v35 = vld [vmem:[%s2484_s1 + $0xb0] sm:$0xff] }
  0x2d   :  { %348 = vmatprep.subr.mxu0 %v1493_v61  ;;  %v160_v36 = vld [vmem:[%s2484_s1 + $0xc8] sm:$0xff]  ;;  %v159_v37 = vld [vmem:[%s2484_s1 + $0xc0] sm:$0xff]  ;;  %v162_v38 = vld [vmem:[%s2484_s1 + $0xd8] sm:$0xff] }
  0x2e   :  { %235 = vperm.xlu0 %1437, %v177_v62   ;;  %240 = vperm.xlu1 %1438, %v178_v63   ;;  %v161_v39 = vld [vmem:[%s2484_s1 + $0xd0] sm:$0xff]  ;;  %v164_v40 = vld [vmem:[%s2484_s1 + $0xe8] sm:$0xff]  ;;  %v163_v41 = vld [vmem:[%s2484_s1 + $0xe0] sm:$0xff] }
  0x2f   :  { %v166_v42 = vld [vmem:[%s2484_s1 + $0xf8] sm:$0xff]  ;;  %v165_v43 = vld [vmem:[%s2484_s1 + $0xf0] sm:$0xff]  ;;  %v899_v44 = vld [vmem:[%s2486_s3] sm:$0xff] }
  0x30   :  { %1237 = vmatpush1.msk.msra.mxu0 %vm312_vm1, %v134_v60  ;;  %1349 = vmatprep.mubr.f32.mxu1 %v899_v44 }
  0x31   :  { %381 = vmatmul.mubr.f32.vlgmr.msra.gmra.mrb[0].mxu0 %v135_v4 }
  0x32   :  { %1239 = vmatprep.mubr.msk.f32.mxu0 %vm263_vm0, %v138_v0  ;;  %245 = vperm.xlu0 %1437, %v179_v1  }
  0x33   :  { %250 = vperm.xlu1 %1438, %v180_v3  }
  0x35   :  { %386 = vmatmul.mubr.f32.gmra.mrb[2].mxu0 %v137_v2 }
  0x36   :  { %1240 = vmatprep.mubr.msk.f32.mxu0 %vm263_vm0, %v140_v5  ;;  %255 = vperm.xlu0 %1437, %v181_v6  }
  0x37   :  { %260 = vperm.xlu1 %1438, %v182_v8  }
  0x39   :  { %391 = vmatmul.mubr.f32.gmra.mrb[4].mxu0 %v139_v7 }
  0x3a   :  { %1241 = vmatprep.mubr.msk.f32.mxu0 %vm263_vm0, %v142_v9  ;;  %909 = vperm.xlu0 %1437, %v903_v10  }
  0x3b   :  { %914 = vperm.xlu1 %1438, %v904_v12  }
  0x3d   :  { %396 = vmatmul.mubr.f32.gmra.mrb[6].mxu0 %v141_v11 }
  0x3e   :  { %1242 = vmatprep.mubr.msk.f32.mxu0 %vm263_vm0, %v144_v13  ;;  %919 = vperm.xlu0 %1437, %v905_v14  }
  0x3f   :  { %924 = vperm.xlu1 %1438, %v906_v16  }
  0x41   :  { %401 = vmatmul.mubr.f32.gmra.mrb[8].mxu0 %v143_v15 }
  0x42   :  { %1243 = vmatprep.mubr.msk.f32.mxu0 %vm263_vm0, %v146_v17  ;;  %1132 = vperm.xlu0 %1437, %v1126_v18  }
  0x43   :  { %1137 = vperm.xlu1 %1438, %v1127_v20  }
  0x45   :  { %406 = vmatmul.mubr.f32.gmra.mrb[10].mxu0 %v145_v19 }
  0x46   :  { %1244 = vmatprep.mubr.msk.f32.mxu0 %vm263_vm0, %v148_v21  ;;  %1142 = vperm.xlu0 %1437, %v1128_v22  }
  0x47   :  { %1147 = vperm.xlu1 %1438, %v1129_v24  }
  0x49   :  { %411 = vmatmul.mubr.f32.gmra.mrb[12].mxu0 %v147_v23 }
  0x4a   :  { %1245 = vmatprep.mubr.msk.f32.mxu0 %vm263_vm0, %v150_v25  ;;  %1170 = vperm.xlu0 %1437, %v1167_v26  }
  0x4d   :  { %416 = vmatmul.mubr.f32.gmra.mrb[14].mxu0 %v149_v27 }
  0x4e   :  { %1246 = vmatprep.mubr.msk.f32.mxu0 %vm263_vm0, %v152_v28 }
  0x51   :  { %421 = vmatmul.mubr.f32.gmra.mrb[16].mxu0 %v151_v29 }
  0x52   :  { %1247 = vmatprep.mubr.msk.f32.mxu0 %vm263_vm0, %v154_v30 }
  0x55   :  { %426 = vmatmul.mubr.f32.gmra.mrb[18].mxu0 %v153_v31 }
  0x56   :  { %1248 = vmatprep.mubr.msk.f32.mxu0 %vm263_vm0, %v156_v32 }
  0x59   :  { %431 = vmatmul.mubr.f32.gmra.mrb[20].mxu0 %v155_v33 }
  0x5a   :  { %1249 = vmatprep.mubr.msk.f32.mxu0 %vm263_vm0, %v158_v34 }
  0x5d   :  { %436 = vmatmul.mubr.f32.gmra.mrb[22].mxu0 %v157_v35 }
  0x5e   :  { %1250 = vmatprep.mubr.msk.f32.mxu0 %vm263_vm0, %v160_v36 }
  0x61   :  { %441 = vmatmul.mubr.f32.gmra.mrb[24].mxu0 %v159_v37 }
  0x62   :  { %1251 = vmatprep.mubr.msk.f32.mxu0 %vm263_vm0, %v162_v38 }
  0x65   :  { %446 = vmatmul.mubr.f32.gmra.mrb[26].mxu0 %v161_v39 }
  0x66   :  { %1252 = vmatprep.mubr.msk.f32.mxu0 %vm263_vm0, %v164_v40 }
  0x69   :  { %451 = vmatmul.mubr.f32.gmra.mrb[28].mxu0 %v163_v41 }
  0x6a   :  { %1253 = vmatprep.mubr.msk.f32.mxu0 %vm263_vm0, %v166_v42 }
  0x6d   :  { %456 = vmatmul.mubr.f32.gmra.mrb[30].mxu0 %v165_v43 }
  0x99   :  { %v186_v45 = vpop.permute.xlu0 %185  ;;  %v196_v55 = vpop.permute.xlu1 %195 }
  0x9d   :  { %v191_v50 = vpop.permute.xlu0 %190  ;;  %v201_v4 = vpop.permute.xlu1 %200 }
  0xa1   :  { %v206_v8 = vpop.permute.xlu0 %205  ;;  %v211_v20 = vpop.permute.xlu1 %210 }
  0xa5   :  { %v216_v30 = vpop.permute.xlu0 %215  ;;  %v221_v39 = vpop.permute.xlu1 %220 }
 0x104   :  { %v382_v46 = vpop.f32.mrb[0].mxu0 }
 0x105   :  { %v1790_v47 = vadd.f32 %v382_v46, %v186_v45  ;;  %v384_v48 = vpop.f32.mrb[1].mxu0 }
 0x107   :  { %v819_v49 = vmax.f32 %v1790_v47, 0.0  ;;  %vm621_vm2 = vcmp.ge.f32.partialorder %v1790_v47, 0.0  ;;  %vm637_vm3 = vcmp.le.f32.partialorder %v1790_v47, 0.5 }
 0x108   :  { %v387_v51 = vpop.f32.mrb[2].mxu0  ;;  %vm1839_vm4 = vmand %vm621_vm2, %vm637_vm3 }
 0x109   :  { %v1793_v52 = vadd.f32 %v387_v51, %v191_v50  ;;  %v389_v53 = vpop.f32.mrb[3].mxu0  ;;  %v835_v54 = vmin.f32 %v819_v49, 3.0  ;;  %v226_v50 = vpop.permute.xlu0 %225 }
 0x10b   :  { %v820_v57 = vmax.f32 %v1793_v52, 0.0  ;;  %v851_v58 = vmul.f32 2.0, %v835_v54  ;;  %vm622_vm5 = vcmp.ge.f32.partialorder %v1793_v52, 0.0  ;;  %vm638_vm6 = vcmp.le.f32.partialorder %v1793_v52, 0.5 }
 0x10c   :  { %v392_v56 = vpop.f32.mrb[4].mxu0  ;;  %vm1944_vm10 = vmand %vm622_vm5, %vm638_vm6  ;;  %vm2513_vm0 = vcmp.le.f32.partialorder %v1793_v52, 0.0 }
 0x10d   :  { %v1796_v59 = vadd.f32 %v392_v56, %v196_v55  ;;  %v394_v60 = vpop.f32.mrb[5].mxu0  ;;  %v836_v61 = vmin.f32 %v820_v57, 3.0  ;;  %v867_v1 = vfloor.f32 %v851_v58 }
 0x10f   :  { %v821_v62 = vmax.f32 %v1796_v59, 0.0  ;;  %v852_v0 = vmul.f32 2.0, %v836_v61  ;;  %v883_v10 = vmul.f32 0.5, %v867_v1  ;;  %v493_v61 = vmul.f32 2.0, %v1790_v47 }
 0x110   :  { %v397_v63 = vpop.f32.mrb[6].mxu0  ;;  %vm623_vm7 = vcmp.ge.f32.partialorder %v1796_v59, 0.0  ;;  %vm639_vm8 = vcmp.le.f32.partialorder %v1796_v59, 0.5 }
 0x111   :  { %v1799_v2 = vadd.f32 %v397_v63, %v201_v4  ;;  %v399_v3 = vpop.f32.mrb[7].mxu0  ;;  %v837_v5 = vmin.f32 %v821_v62, 3.0  ;;  %v868_v6 = vfloor.f32 %v852_v0  ;;  %v231_v62 = vpop.permute.xlu1 %230  ;;  %v494_v4 = vmul.f32 2.0, %v1793_v52  ;;  %vm1958_vm5 = vmand %vm623_vm7, %vm639_vm8 }
 0x113   :  { %v822_v7 = vmax.f32 %v1799_v2, 0.0  ;;  %v884_v11 = vmul.f32 0.5, %v868_v6  ;;  %v853_v12 = vmul.f32 2.0, %v837_v5  ;;  %vm624_vm13 = vcmp.ge.f32.partialorder %v1799_v2, 0.0 }
 0x114   :  { %v402_v9 = vpop.f32.mrb[8].mxu0  ;;  %vm640_vm14 = vcmp.le.f32.partialorder %v1799_v2, 0.5 }
 0x115   :  { %v1802_v13 = vadd.f32 %v402_v9, %v206_v8  ;;  %v404_v14 = vpop.f32.mrb[9].mxu0  ;;  %v838_v15 = vmin.f32 %v822_v7, 3.0  ;;  %v1379_v16 = vpack.c.bf16 %v884_v11, %v883_v10  ;;  %v869_v18 = vfloor.f32 %v853_v12  ;;  %v236_v10 = vpop.permute.xlu0 %235  ;;  %vm1972_vm7 = vmand %vm624_vm13, %vm640_vm14 }
 0x116   :  { %v1254_v11 = vadd.f32 -0.5, %v493_v61  ;;  %v1255_v12 = vadd.f32 -0.5, %v494_v4  ;;  %v495_v14 = vmul.f32 2.0, %v1796_v59 }
 0x117   :  { %v854_v17 = vmul.f32 2.0, %v838_v15  ;;  %v823_v19 = vmax.f32 %v1802_v13, 0.0  ;;  %1380 = vmatprep.subr.bf16.mxu1 %v1379_v16  ;;  %v885_v26 = vmul.f32 0.5, %v869_v18  ;;  %vm625_vm2 = vcmp.ge.f32.partialorder %v1802_v13, 0.0 }
 0x118   :  { %v407_v21 = vpop.f32.mrb[10].mxu0  ;;  %1382 = vmatpush3.bf16.msra.mxu1 %v1379_v16  ;;  %vm641_vm12 = vcmp.le.f32.partialorder %v1802_v13, 0.5  ;;  %vm2523_vm15 = vcmp.le.f32.partialorder %v1802_v13, 0.0 }
 0x119   :  { %v1805_v22 = vadd.f32 %v407_v21, %v211_v20  ;;  %v409_v23 = vpop.f32.mrb[11].mxu0  ;;  %v870_v24 = vfloor.f32 %v854_v17  ;;  %v839_v25 = vmin.f32 %v823_v19, 3.0  ;;  %vm1983_vm1 = vmand %vm625_vm2, %vm641_vm12 }
 0x11b   :  { %v886_v27 = vmul.f32 0.5, %v870_v24  ;;  %v824_v28 = vmax.f32 %v1805_v22, 0.0  ;;  %v855_v29 = vmul.f32 2.0, %v839_v25  ;;  %v1270_v24 = vadd.f32 -1e-05, %v1254_v11 }
 0x11c   :  { %v412_v31 = vpop.f32.mrb[12].mxu0  ;;  %v1271_v25 = vadd.f32 -1e-05, %v1255_v12  ;;  %vm642_vm3 = vcmp.le.f32.partialorder %v1805_v22, 0.5  ;;  %vm2503_vm12 = vcmp.ge.f32.partialorder %v1805_v22, 0.0 }
 0x11d   :  { %v1808_v32 = vadd.f32 %v412_v31, %v216_v30  ;;  %v414_v33 = vpop.f32.mrb[13].mxu0  ;;  %v1383_v34 = vpack.c.bf16 %v886_v27, %v885_v26  ;;  %v840_v35 = vmin.f32 %v824_v28, 3.0  ;;  %v871_v37 = vfloor.f32 %v855_v29  ;;  %v241_v26 = vpop.permute.xlu1 %240  ;;  %vm2001_vm2 = vmand %vm2503_vm12, %vm642_vm3 }
 0x11e   :  { %v1256_v27 = vadd.f32 -0.5, %v495_v14  ;;  %v496_v29 = vmul.f32 2.0, %v1799_v2 }
 0x11f   :  { %1384 = vmatprep.subr.bf16.mxu1 %v1383_v34  ;;  %v856_v36 = vmul.f32 2.0, %v840_v35  ;;  %v825_v38 = vmax.f32 %v1808_v32, 0.0  ;;  %v887_v45 = vmul.f32 0.5, %v871_v37  ;;  %v1832_v35 = vmul.f32 0.5, %v1790_v47 }
 0x120   :  { %v417_v40 = vpop.f32.mrb[14].mxu0  ;;  %1386 = vmatpush3.bf16.msra.mxu1 %v1383_v34  ;;  %vm643_vm9 = vcmp.le.f32.partialorder %v1808_v32, 0.5  ;;  %vm2506_vm3 = vcmp.ge.f32.partialorder %v1808_v32, 0.0 }
 0x121   :  { %v1811_v41 = vadd.f32 %v417_v40, %v221_v39  ;;  %v419_v42 = vpop.f32.mrb[15].mxu0  ;;  %v872_v43 = vfloor.f32 %v856_v36  ;;  %v841_v44 = vmin.f32 %v825_v38, 3.0  ;;  %vm2018_vm12 = vmand %vm2506_vm3, %vm643_vm9  ;;  %vm2512_vm3 = vcmp.le.f32.partialorder %v1790_v47, 0.0 }
 0x122   :  { %v1411_v42 = vround.rtne.f32 %v1270_v24  ;;  %v722_v40 = vmul.f32 0.5, %v1805_v22 }
 0x123   :  { %v888_v46 = vmul.f32 0.5, %v872_v43  ;;  %v826_v48 = vmax.f32 %v1811_v41, 0.0  ;;  %v857_v49 = vmul.f32 2.0, %v841_v44  ;;  %v246_v43 = vpop.permute.xlu0 %245  ;;  %v1412_v44 = vround.rtne.f32 %v1271_v25 }
 0x124   :  { %v422_v51 = vpop.f32.mrb[16].mxu0  ;;  %v1857_v4 = vmul.f32 2.0, %v1411_v42  ;;  %v500_v12 = vmul.f32 2.0, %v1811_v41  ;;  %vm644_vm8 = vcmp.le.f32.partialorder %v1811_v41, 0.5  ;;  %vm2509_vm6 = vcmp.ge.f32.partialorder %v1811_v41, 0.0 }
 0x125   :  { %v1814_v53 = vadd.f32 %v422_v51, %v226_v50  ;;  %v424_v54 = vpop.f32.mrb[17].mxu0  ;;  %v1387_v55 = vpack.c.bf16 %v888_v46, %v887_v45  ;;  %v842_v56 = vmin.f32 %v826_v48, 3.0  ;;  %v873_v58 = vfloor.f32 %v857_v49  ;;  %vm2033_vm9 = vmand %vm2509_vm6, %vm644_vm8 }
 0x126   :  { %v1843_v45 = vadd.f32 -1e-05, %v1256_v27  ;;  %v1257_v54 = vadd.f32 -0.5, %v496_v29 }
 0x127   :  { %1388 = vmatprep.subr.bf16.mxu1 %v1387_v55  ;;  %v858_v57 = vmul.f32 2.0, %v842_v56  ;;  %v827_v60 = vmax.f32 %v1814_v53, 0.0  ;;  %v889_v6 = vmul.f32 0.5, %v873_v58  ;;  %v498_v56 = vmul.f32 2.0, %v1805_v22 }
 0x128   :  { %v427_v63 = vpop.f32.mrb[18].mxu0  ;;  %1390 = vmatpush3.bf16.msra.mxu1 %v1387_v55  ;;  %v497_v55 = vmul.f32 2.0, %v1802_v13  ;;  %v1854_v58 = vmul.f32 0.5, %v1793_v52  ;;  %v1865_v11 = vadd.f32 -1e-05, %v1257_v54  ;;  %v501_v14 = vmul.f32 2.0, %v1814_v53 }
 0x129   :  { %v1819_v0 = vadd.f32 %v427_v63, %v231_v62  ;;  %v429_v1 = vpop.f32.mrb[19].mxu0  ;;  %v874_v3 = vfloor.f32 %v858_v57  ;;  %v843_v5 = vmin.f32 %v827_v60, 3.0  ;;  %v733_v57 = vsel %vm1839_vm4, %v1832_v35, %v1790_v47 }
 0x12a   :  { %v1859_v63 = vmul.f32 2.0, %v1412_v44  ;;  %v251_v1 = vpop.permute.xlu1 %250  ;;  %vm645_vm11 = vcmp.le.f32.partialorder %v1814_v53, 0.5  ;;  %vm2514_vm6 = vcmp.ge.f32.partialorder %v1814_v53, 0.0 }
 0x12b   :  { %v890_v7 = vmul.f32 0.5, %v874_v3  ;;  %v828_v8 = vmax.f32 %v1819_v0, 0.0  ;;  %v859_v9 = vmul.f32 2.0, %v843_v5  ;;  %v499_v5 = vmul.f32 2.0, %v1808_v32  ;;  %vm2051_vm8 = vmand %vm2514_vm6, %vm645_vm11 }
 0x12c   :  { %v432_v15 = vpop.f32.mrb[20].mxu0  ;;  %v502_v25 = vmul.f32 2.0, %v1819_v0  ;;  %vm2518_vm11 = vcmp.le.f32.partialorder %v1799_v2, 0.0  ;;  %vm2525_vm6 = vcmp.ge.f32.partialorder %v1793_v52, 3.25 }
 0x12d   :  { %v1823_v16 = vadd.f32 %v432_v15, %v236_v10  ;;  %v434_v17 = vpop.f32.mrb[21].mxu0  ;;  %v1391_v18 = vpack.c.bf16 %v890_v7, %v889_v6  ;;  %v844_v19 = vmin.f32 %v828_v8, 3.0  ;;  %v875_v21 = vfloor.f32 %v859_v9 }
 0x12e   :  { %v1413_v6 = vround.rtne.f32 %v1843_v45  ;;  %v1258_v15 = vadd.f32 -0.5, %v497_v55  ;;  %v1259_v17 = vadd.f32 -0.5, %v498_v56 }
 0x12f   :  { %1392 = vmatprep.subr.bf16.mxu1 %v1391_v18  ;;  %v860_v20 = vmul.f32 2.0, %v844_v19  ;;  %v829_v23 = vmax.f32 %v1823_v16, 0.0  ;;  %v891_v36 = vmul.f32 0.5, %v875_v21 }
 0x130   :  { %v437_v28 = vpop.f32.mrb[22].mxu0  ;;  %1394 = vmatpush3.bf16.msra.mxu1 %v1391_v18  ;;  %v1274_v42 = vadd.f32 -1e-05, %v1258_v15 }
 0x131   :  { %v1829_v30 = vadd.f32 %v437_v28, %v241_v26  ;;  %v439_v31 = vpop.f32.mrb[23].mxu0  ;;  %v876_v33 = vfloor.f32 %v860_v20  ;;  %v845_v34 = vmin.f32 %v829_v23, 3.0  ;;  %v256_v23 = vpop.permute.xlu0 %255  ;;  %v503_v26 = vmul.f32 2.0, %v1823_v16 }
 0x132   :  { %v1260_v28 = vadd.f32 -0.5, %v499_v5 }
 0x133   :  { %v892_v37 = vmul.f32 0.5, %v876_v33  ;;  %v830_v38 = vmax.f32 %v1829_v30, 0.0  ;;  %v861_v39 = vmul.f32 2.0, %v845_v34  ;;  %v504_v27 = vmul.f32 2.0, %v1829_v30 }
 0x134   :  { %v442_v46 = vpop.f32.mrb[24].mxu0  ;;  %v1264_v54 = vadd.f32 -0.5, %v503_v26  ;;  %v1276_v56 = vadd.f32 -1e-05, %v1260_v28 }
 0x135   :  { %v1845_v48 = vadd.f32 %v442_v46, %v246_v43  ;;  %v444_v49 = vpop.f32.mrb[25].mxu0  ;;  %v1395_v50 = vpack.c.bf16 %v892_v37, %v891_v36  ;;  %v846_v51 = vmin.f32 %v830_v38, 3.0  ;;  %v877_v61 = vfloor.f32 %v861_v39 }
 0x136   :  { %v1261_v38 = vadd.f32 -0.5, %v500_v12  ;;  %v1262_v39 = vadd.f32 -0.5, %v501_v14  ;;  %v1275_v46 = vadd.f32 -1e-05, %v1259_v17  ;;  %v261_v49 = vpop.permute.xlu1 %260  ;;  %v1265_v55 = vadd.f32 -0.5, %v504_v27 }
 0x137   :  { %1396 = vmatprep.subr.bf16.mxu1 %v1395_v50  ;;  %v862_v60 = vmul.f32 2.0, %v846_v51  ;;  %v831_v62 = vmax.f32 %v1845_v48, 0.0  ;;  %v893_v18 = vmul.f32 0.5, %v877_v61  ;;  %v505_v36 = vmul.f32 2.0, %v1845_v48 }
 0x138   :  { %v447_v3 = vpop.f32.mrb[26].mxu0  ;;  %1398 = vmatpush3.bf16.msra.mxu1 %v1395_v50  ;;  %v1263_v51 = vadd.f32 -0.5, %v502_v25  ;;  %v1281_v25 = vadd.f32 -1e-05, %v1265_v55 }
 0x139   :  { %v1863_v7 = vadd.f32 %v447_v3, %v251_v1  ;;  %v449_v8 = vpop.f32.mrb[27].mxu0  ;;  %v878_v9 = vfloor.f32 %v862_v60  ;;  %v847_v10 = vmin.f32 %v831_v62, 3.0  ;;  %v1266_v3 = vadd.f32 -0.5, %v505_v36 }
 0x13b   :  { %v894_v19 = vmul.f32 0.5, %v878_v9  ;;  %v832_v20 = vmax.f32 %v1863_v7, 0.0  ;;  %v863_v21 = vmul.f32 2.0, %v847_v10  ;;  %v506_v37 = vmul.f32 2.0, %v1863_v7 }
 0x13c   :  { %v452_v24 = vpop.f32.mrb[28].mxu0  ;;  %v1277_v9 = vadd.f32 -1e-05, %v1261_v38  ;;  %v1278_v10 = vadd.f32 -1e-05, %v1262_v39  ;;  %v1417_v38 = vround.rtne.f32 %v1276_v56 }
 0x13d   :  { %v1873_v29 = vadd.f32 %v452_v24, %v256_v23  ;;  %v454_v31 = vpop.f32.mrb[29].mxu0  ;;  %v1399_v33 = vpack.c.bf16 %v894_v19, %v893_v18  ;;  %v848_v34 = vmin.f32 %v832_v20, 3.0  ;;  %v879_v44 = vfloor.f32 %v863_v21 }
 0x13e   :  { %v1267_v8 = vadd.f32 -0.5, %v506_v37  ;;  %v1279_v19 = vadd.f32 -1e-05, %v1263_v51  ;;  %v1280_v20 = vadd.f32 -1e-05, %v1264_v54  ;;  %v559_v21 = vmul.f32 2.0, %v1413_v6 }
 0x13f   :  { %1400 = vmatprep.subr.bf16.mxu1 %v1399_v33  ;;  %v864_v43 = vmul.f32 2.0, %v848_v34  ;;  %v833_v45 = vmax.f32 %v1873_v29, 0.0  ;;  %v507_v5 = vmul.f32 2.0, %v1873_v29  ;;  %v895_v12 = vmul.f32 0.5, %v879_v44 }
 0x140   :  { %v457_v50 = vpop.f32.mrb[30].mxu0  ;;  %1402 = vmatpush3.bf16.msra.mxu1 %v1399_v33  ;;  %v1282_v26 = vadd.f32 -1e-05, %v1266_v3  ;;  %v1283_v28 = vadd.f32 -1e-05, %v1267_v8  ;;  %v1414_v31 = vround.rtne.f32 %v1865_v11  ;;  %v1415_v33 = vround.rtne.f32 %v1274_v42 }
 0x141   :  { %v1878_v60 = vadd.f32 %v457_v50, %v261_v49  ;;  %v459_v61 = vpop.f32.mrb[31].mxu0  ;;  %v880_v62 = vfloor.f32 %v864_v43  ;;  %v849_v1 = vmin.f32 %v833_v45, 3.0  ;;  %v1268_v27 = vadd.f32 -0.5, %v507_v5 }
 0x142   :  { %v1416_v37 = vround.rtne.f32 %v1275_v46  ;;  %v1418_v43 = vround.rtne.f32 %v1277_v9  ;;  %v1419_v44 = vround.rtne.f32 %v1278_v10  ;;  %v1420_v45 = vround.rtne.f32 %v1279_v19 }
 0x143   :  { %v896_v14 = vmul.f32 0.5, %v880_v62  ;;  %v834_v15 = vmax.f32 %v1878_v60, 0.0  ;;  %v865_v17 = vmul.f32 2.0, %v849_v1  ;;  %v508_v18 = vmul.f32 2.0, %v1878_v60 }
 0x144   :  { %v1421_v49 = vround.rtne.f32 %v1280_v20  ;;  %v1422_v50 = vround.rtne.f32 %v1281_v25  ;;  %v1423_v51 = vround.rtne.f32 %v1282_v26  ;;  %v1284_v54 = vadd.f32 -1e-05, %v1268_v27  ;;  %v900_v26 = vld [vmem:[%s2486_s3 + $0x8] sm:$0xff] }
 0x145   :  { %v1403_v23 = vpack.c.bf16 %v896_v14, %v895_v12  ;;  %v850_v24 = vmin.f32 %v834_v15, 3.0  ;;  %v881_v36 = vfloor.f32 %v865_v17  ;;  %v1269_v39 = vadd.f32 -0.5, %v508_v18 }
 0x146   :  { %v1424_v55 = vround.rtne.f32 %v1283_v28  ;;  %v560_v61 = vmul.f32 2.0, %v1414_v31  ;;  %v561_v62 = vmul.f32 2.0, %v1415_v33  ;;  %v562_v1 = vmul.f32 2.0, %v1416_v37 }
 0x147   :  { %1404 = vmatprep.subr.bf16.mxu1 %v1403_v23  ;;  %v866_v34 = vmul.f32 2.0, %v850_v24  ;;  %v897_v11 = vmul.f32 0.5, %v881_v36  ;;  %v563_v3 = vmul.f32 2.0, %v1417_v38  ;;  %v1285_v5 = vadd.f32 -1e-05, %v1269_v39 }
 0x148   :  { %1406 = vmatpush3.bf16.msra.mxu1 %v1403_v23  ;;  %v564_v46 = vmul.f32 2.0, %v1418_v43  ;;  %v565_v56 = vmul.f32 2.0, %v1419_v44  ;;  %v566_v8 = vmul.f32 2.0, %v1420_v45  ;;  %v567_v9 = vmul.f32 2.0, %v1421_v49 }
 0x149   :  { %v882_v6 = vfloor.f32 %v866_v34  ;;  %v568_v10 = vmul.f32 2.0, %v1422_v50  ;;  %v569_v14 = vmul.f32 2.0, %v1423_v51  ;;  %v1425_v15 = vround.rtne.f32 %v1284_v54  ;;  %v902_v50 = vld [vmem:[%s2486_s3 + $0x18] sm:$0xff] }
 0x14a   :  { %v570_v17 = vmul.f32 2.0, %v1424_v55  ;;  %v573_v18 = vadd.f32 1.0, %v1857_v4  ;;  %v574_v19 = vadd.f32 1.0, %v1859_v63  ;;  %v575_v20 = vadd.f32 1.0, %v559_v21  ;;  %v901_v4 = vld [vmem:[%s2486_s3 + $0x10] sm:$0xff]  ;;  %s1494_s3 = smov [#allocation5]  }
 0x14b   :  { %v898_v42 = vmul.f32 0.5, %v882_v6  ;;  %v576_v23 = vadd.f32 1.0, %v560_v61  ;;  %v577_v24 = vadd.f32 1.0, %v561_v62  ;;  %v578_v25 = vadd.f32 1.0, %v562_v1  ;;  %s1225_s10 = sshll.u32 %s1494_s3, 4  ;;  %s1226_s10 = int_to_ptr.vmem [resolvable:$true] %s1225_s10 }
 0x14c   :  { %v1426_v27 = vround.rtne.f32 %v1285_v5  ;;  %v579_v28 = vadd.f32 1.0, %v563_v3  ;;  %v580_v31 = vadd.f32 1.0, %v564_v46  ;;  %v581_v33 = vadd.f32 1.0, %v565_v56  ;;  %s1443_s4 = scalar_lea.vmem %s1226_s10, 16  ;;  %s1447_s6 = scalar_lea.vmem %s1226_s10, 32 }
 0x14d   :  { %v1407_v12 = vpack.c.bf16 %v898_v42, %v897_v11  ;;  %v582_v63 = vadd.f32 1.0, %v566_v8  ;;  %v583_v21 = vadd.f32 1.0, %v567_v9  ;;  %v584_v34 = vadd.f32 1.0, %v568_v10  ;;  %p1444_p0 = scmp.ne.s32.totalorder %s1226_s10, %s1443_s4  ;;  %p1448_p1 = scmp.lt.s32.totalorder %s1226_s10, %s1226_s10 }
 0x14e   :  { %v585_v36 = vadd.f32 1.0, %v569_v14  ;;  %v571_v37 = vmul.f32 2.0, %v1425_v15  ;;  %v586_v38 = vadd.f32 1.0, %v570_v17  ;;  %v589_v39 = vmul.f32 0.5, %v573_v18  ;;  %p1449_p2 = scmp.lt.s32.totalorder %s1447_s6, %s1443_s4 }
 0x14f   :  { %1408 = vmatprep.subr.bf16.mxu1 %v1407_v12  ;;  %v590_v43 = vmul.f32 0.5, %v574_v19  ;;  %v591_v44 = vmul.f32 0.5, %v575_v20  ;;  %v592_v45 = vmul.f32 0.5, %v576_v23  ;;  %v593_v6 = vmul.f32 0.5, %v577_v24 }
 0x150   :  { %1410 = vmatpush3.bf16.msra.mxu1 %v1407_v12  ;;  %v594_v49 = vmul.f32 0.5, %v578_v25  ;;  %v572_v51 = vmul.f32 2.0, %v1426_v27  ;;  %v595_v54 = vmul.f32 0.5, %v579_v28  ;;  %v596_v55 = vmul.f32 0.5, %v580_v31  ;;  %p1450_p3 = por %p1449_p2, %p1448_p1 }
 0x151   :  { %v597_v61 = vmul.f32 0.5, %v581_v33  ;;  %v598_v62 = vmul.f32 0.5, %v582_v63  ;;  %v599_v11 = vmul.f32 0.5, %v583_v21  ;;  %v600_v42 = vmul.f32 0.5, %v584_v34 }
 0x152   :  { %v601_v1 = vmul.f32 0.5, %v585_v36  ;;  %v587_v3 = vadd.f32 1.0, %v571_v37  ;;  %v602_v5 = vmul.f32 0.5, %v586_v38  ;;  %v1899_v46 = vmul.f32 0.5, %v589_v39  ;;  %p1451_p4 = pnand %p1450_p3, %p1444_p0 }
 0x153   :  { %1350 = vmatmul.mubr.f32.vlgmr.msra.gmra.mrb[0].mxu1 %v900_v26  ;;  %v1901_v56 = vmul.f32 0.5, %v590_v43  ;;  %v1903_v8 = vmul.f32 0.5, %v591_v44  ;;  %v1905_v12 = vmul.f32 0.5, %v592_v45  ;;  %v1907_v9 = vmul.f32 0.5, %v593_v6 }
 0x154   :  { %1352 = vmatprep.mubr.f32.mxu1 %v901_v4  ;;  %v1909_v10 = vmul.f32 0.5, %v594_v49  ;;  %v588_v14 = vadd.f32 1.0, %v572_v51  ;;  %v1913_v15 = vmul.f32 0.5, %v595_v54  ;;  %v1915_v17 = vmul.f32 0.5, %v596_v55 }
 0x155   :  { %v1917_v18 = vmul.f32 0.5, %v597_v61  ;;  %v1920_v19 = vmul.f32 0.5, %v598_v62  ;;  %v1922_v20 = vmul.f32 0.5, %v599_v11  ;;  %v1924_v23 = vmul.f32 0.5, %v600_v42 }
 0x156   :  { %v1926_v24 = vmul.f32 0.5, %v601_v1  ;;  %v603_v25 = vmul.f32 0.5, %v587_v3  ;;  %v1929_v26 = vmul.f32 0.5, %v602_v5  ;;  %v604_v28 = vmul.f32 0.5, %v588_v14 }
 0x157   :  { %1353 = vmatmul.mubr.f32.gmra.mrb[2].mxu1 %v902_v50  ;;  %v669_v21 = vsel %vm1839_vm4, 0.0, %v1899_v46  ;;  %v670_v34 = vsel %vm1944_vm10, 0.0, %v1901_v56  ;;  %v671_v37 = vsel %vm1958_vm5, 0.0, %v1903_v8  ;;  %v672_v43 = vsel %vm1972_vm7, 0.0, %v1905_v12 }
 0x158   :  { %v1976_v4 = vmul.f32 0.5, %v603_v25  ;;  %v2010_v38 = vmul.f32 0.5, %v604_v28  ;;  %v673_v45 = vsel %vm1983_vm1, 0.0, %v1907_v9  ;;  %v685_v6 = vsel %vm2512_vm3, %v1790_v47, %v669_v21 }
 0x159   :  { %v686_v49 = vsel %vm2513_vm0, %v1793_v52, %v670_v34  ;;  %v674_v51 = vsel %vm2001_vm2, 0.0, %v1909_v10  ;;  %v675_v54 = vsel %vm2018_vm12, 0.0, %v1913_v15  ;;  %vm2517_vm0 = vcmp.le.f32.partialorder %v1796_v59, 0.0 }
 0x15a   :  { %v687_v55 = vsel %vm2517_vm0, %v1796_v59, %v671_v37  ;;  %v676_v61 = vsel %vm2033_vm9, 0.0, %v1915_v17  ;;  %v677_v62 = vsel %vm2051_vm8, 0.0, %v1917_v18  ;;  %v688_v11 = vsel %vm2518_vm11, %v1799_v2, %v672_v43 }
 0x15b   :  { %v719_v42 = vmul.f32 0.5, %v1796_v59  ;;  %vm2519_vm0 = vcmp.le.f32.partialorder %v1819_v0, 0.5  ;;  %vm2520_vm3 = vcmp.ge.f32.partialorder %v1819_v0, 0.0  ;;  %v2521_v1 = vmov 0 }
 0x15c   :  { %vm2080_vm14 = vmand %vm2520_vm3, %vm2519_vm0  ;;  %v689_v3 = vsel %vm2523_vm15, %v1802_v13, %v673_v45  ;;  %vm2524_vm11 = vcmp.ge.f32.partialorder %v1790_v47, 3.25  ;;  %v702_v46 = vsel %vm2525_vm6, %v1793_v52, %v686_v49  ;;  %v720_v56 = vmul.f32 0.5, %v1799_v2 }
 0x15d   :  { %v2522_v1 = vsel %vm2080_vm14, 4294967295, %v2521_v1  ;;  %v701_v5 = vsel %vm2524_vm11, %v1790_v47, %v685_v6  ;;  %v678_v8 = vsel %vm2080_vm14, 0.0, %v1920_v19  ;;  %vm2526_vm15 = vcmp.le.f32.partialorder %v1805_v22, 0.0 }
 0x15e   :  { %v690_v12 = vsel %vm2526_vm15, %v1805_v22, %v674_v51  ;;  %vm2527_vm0 = vcmp.le.f32.partialorder %v1808_v32, 0.0  ;;  %vm2528_vm6 = vcmp.ge.f32.partialorder %v1796_v59, 3.25  ;;  %vm2529_vm11 = vcmp.le.f32.partialorder %v1823_v16, 0.5 }
 0x15f   :  { %v691_v9 = vsel %vm2527_vm0, %v1808_v32, %v675_v54  ;;  %v703_v10 = vsel %vm2528_vm6, %v1796_v59, %v687_v55  ;;  %vm2530_vm3 = vcmp.ge.f32.partialorder %v1823_v16, 0.0  ;;  %vm2533_vm14 = vcmp.le.f32.partialorder %v1811_v41, 0.0 }
 0x160   :  { %vm2112_vm13 = vmand %vm2530_vm3, %vm2529_vm11  ;;  %v692_v15 = vsel %vm2533_vm14, %v1811_v41, %v676_v61  ;;  %vm2534_vm15 = vcmp.ge.f32.partialorder %v1799_v2, 3.25  ;;  %v721_v18 = vmul.f32 0.5, %v1802_v13  ;;  %v734_v19 = vsel %vm1944_vm10, %v1854_v58, %v1793_v52 }
 0x161   :  { %v704_v17 = vsel %vm2534_vm15, %v1799_v2, %v688_v11  ;;  %vm651_vm0 = vcmp.le.f32.partialorder %v1873_v29, 0.5  ;;  %v679_v25 = vsel %vm2112_vm13, 0.0, %v1922_v20  ;;  %v735_v28 = vsel %vm1958_vm5, %v719_v42, %v1796_v59 }
 0x162   :  { %v749_v21 = vsub.f32 %v733_v57, %v701_v5  ;;  %v750_v27 = vsub.f32 %v734_v19, %v702_v46  ;;  %vm473_vm10 = vcmp.le.f32.partialorder %v1845_v48, 0.0  ;;  %vm2535_vm14 = vcmp.le.f32.partialorder %v1829_v30, 0.5 }
 0x163   :  { %vm2536_vm6 = vcmp.ge.f32.partialorder %v1829_v30, 0.0  ;;  %vm2539_vm5 = vcmp.ge.f32.partialorder %v1802_v13, 3.25  ;;  %v736_v47 = vsel %vm1972_vm7, %v720_v56, %v1799_v2  ;;  %v751_v35 = vsub.f32 %v735_v28, %v703_v10 }
 0x164   :  { %vm2145_vm11 = vmand %vm2536_vm6, %vm2535_vm14  ;;  %v705_v59 = vsel %vm2539_vm5, %v1802_v13, %v689_v3  ;;  %vm2540_vm15 = vcmp.le.f32.partialorder %v1814_v53, 0.0  ;;  %vm2541_vm14 = vcmp.le.f32.partialorder %v1819_v0, 0.0  ;;  %v752_v31 = vsub.f32 %v736_v47, %v704_v17 }
 0x165   :  { %v680_v57 = vsel %vm2145_vm11, 0.0, %v1924_v23  ;;  %v693_v58 = vsel %vm2540_vm15, %v1814_v53, %v677_v62  ;;  %v694_v20 = vsel %vm2541_vm14, %v1819_v0, %v678_v8  ;;  %vm2542_vm6 = vcmp.le.f32.partialorder %v1845_v48, 0.5 }
 0x166   :  { %vm2543_vm7 = vcmp.ge.f32.partialorder %v1845_v48, 0.0  ;;  %vm2546_vm4 = vcmp.le.f32.partialorder %v1823_v16, 0.0  ;;  %vm2547_vm15 = vcmp.ge.f32.partialorder %v1805_v22, 3.25  ;;  %v723_v34 = vmul.f32 0.5, %v1808_v32 }
 0x167   :  { %vm2170_vm5 = vmand %vm2543_vm7, %vm2542_vm6  ;;  %v695_v23 = vsel %vm2546_vm4, %v1823_v16, %v679_v25  ;;  %v706_v33 = vsel %vm2547_vm15, %v1805_v22, %v690_v12  ;;  %v737_v37 = vsel %vm1983_vm1, %v721_v18, %v1802_v13  ;;  %vm487_vm14 = vcmp.ge.f32.partialorder %v1823_v16, 3.25 }
 0x168   :  { %v681_v43 = vsel %vm2170_vm5, 0.0, %v1926_v24  ;;  %v753_v45 = vsub.f32 %v737_v37, %v705_v59  ;;  %v765_v6 = vand.u32 2147483647, %v749_v21  ;;  %v766_v49 = vand.u32 2147483647, %v750_v27 }
 0x169   :  { %vm474_vm4 = vcmp.le.f32.partialorder %v1863_v7, 0.0  ;;  %vm2548_vm15 = vcmp.le.f32.partialorder %v1863_v7, 0.5  ;;  %vm2549_vm3 = vcmp.ge.f32.partialorder %v1863_v7, 0.0  ;;  %vm2552_vm6 = vcmp.ge.f32.partialorder %v1808_v32, 3.25 }
 0x16a   :  { %vm2195_vm1 = vmand %vm2549_vm3, %vm2548_vm15  ;;  %v707_v63 = vsel %vm2552_vm6, %v1808_v32, %v691_v9  ;;  %v724_v51 = vmul.f32 0.5, %v1811_v41  ;;  %v738_v24 = vsel %vm2001_vm2, %v722_v40, %v1805_v22  ;;  %v767_v54 = vand.u32 2147483647, %v751_v35 }
 0x16b   :  { %v682_v55 = vsel %vm2195_vm1, 0.0, %v1929_v26  ;;  %vm2553_vm3 = vcmp.le.f32.partialorder %v1829_v30, 0.0  ;;  %v754_v62 = vsub.f32 %v738_v24, %v706_v33  ;;  %v768_v11 = vand.u32 2147483647, %v752_v31 }
 0x16c   :  { %v696_v61 = vsel %vm2553_vm3, %v1829_v30, %v680_v57  ;;  %vm2554_vm6 = vcmp.ge.f32.partialorder %v1811_v41, 3.25  ;;  %vm2555_vm2 = vcmp.ge.f32.partialorder %v1814_v53, 3.25  ;;  %v725_v36 = vmul.f32 0.5, %v1814_v53 }
 0x16d   :  { %v708_v42 = vsel %vm2554_vm6, %v1811_v41, %v692_v15  ;;  %v709_v22 = vsel %vm2555_vm2, %v1814_v53, %v693_v58  ;;  %v739_v26 = vsel %vm2018_vm12, %v723_v34, %v1808_v32  ;;  %vm489_vm15 = vcmp.ge.f32.partialorder %v1845_v48, 3.25 }
 0x16e   :  { %v755_v3 = vsub.f32 %v739_v26, %v707_v63  ;;  %v769_v5 = vand.u32 2147483647, %v753_v45  ;;  %vm2556_vm3 = vcmask 64512   ;;  %v726_v8 = vmul.f32 0.5, %v1819_v0 }
 0x16f   :  { %v782_v46 = vsel %vm2556_vm3, %v765_v6, 0.0  ;;  %vm2557_vm7 = vmmov %vm2556_vm3  ;;  %v740_v12 = vsel %vm2033_vm9, %v724_v51, %v1811_v41  ;;  %vm490_vm12 = vcmp.ge.f32.partialorder %v1863_v7, 3.25  ;;  %v697_v32 = vsel %vm473_vm10, %v1845_v48, %v681_v43 }
 0x170   :  { %v783_v56 = vsel %vm2557_vm7, %v766_v49, 0.0  ;;  %vm2558_vm2 = vmmov %vm2556_vm3  ;;  %v756_v10 = vsub.f32 %v740_v12, %v708_v42  ;;  %v770_v15 = vand.u32 2147483647, %v754_v62  ;;  %vm476_vm3 = vcmp.le.f32.partialorder %v1878_v60, 0.0 }
 0x171   :  { %v784_v9 = vadd.f32 %v783_v56, %v782_v46  ;;  %v785_v39 = vsel %vm2558_vm2, %v767_v54, 0.0  ;;  %vm2559_vm7 = vmmov %vm2558_vm2  ;;  %vm2560_vm6 = vcmp.ge.f32.partialorder %v1873_v29, 0.0  ;;  %vm2563_vm2 = vcmp.ge.f32.partialorder %v1819_v0, 3.25 }
 0x172   :  { %v787_v17 = vsel %vm2559_vm7, %v768_v11, 0.0  ;;  %vm2242_vm9 = vmand %vm2560_vm6, %vm651_vm0  ;;  %v710_v44 = vsel %vm2563_vm2, %v1819_v0, %v694_v20  ;;  %v727_v18 = vmul.f32 0.5, %v1823_v16  ;;  %v741_v19 = vsel %vm2051_vm8, %v725_v36, %v1814_v53 }
 0x173   :  { %v786_v25 = vadd.f32 %v785_v39, %v784_v9  ;;  %vm491_vm10 = vcmp.ge.f32.partialorder %v1873_v29, 3.25  ;;  %v683_v28 = vsel %vm2242_vm9, 0.0, %v1976_v4  ;;  %v757_v21 = vsub.f32 %v741_v19, %v709_v22  ;;  %vm2564_vm0 = vmmov %vm2559_vm7 }
 0x174   :  { %v771_v27 = vand.u32 2147483647, %v755_v3  ;;  %v789_v59 = vsel %vm2564_vm0, %v769_v5, 0.0  ;;  %v711_v40 = vsel %vm487_vm14, %v1823_v16, %v695_v23  ;;  %v728_v47 = vmul.f32 0.5, %v1829_v30  ;;  %vm2566_vm6 = vmmov %vm2564_vm0 }
 0x175   :  { %vm2565_vm8 = vnez %v2522_v1  ;;  %v788_v50 = vadd.f32 %v787_v17, %v786_v25  ;;  %v698_v35 = vsel %vm474_vm4, %v1863_v7, %v682_v55  ;;  %v772_v57 = vand.u32 2147483647, %v756_v10  ;;  %vm2572_vm4 = vmmov %vm2566_vm6 }
 0x176   :  { %v742_v53 = vsel %vm2565_vm8, %v726_v8, %v1819_v0  ;;  %v791_v58 = vsel %vm2566_vm6, %v770_v15, 0.0  ;;  %vm2567_vm7 = vcmp.le.f32.partialorder %v1878_v60, 0.5  ;;  %vm2568_vm2 = vcmp.ge.f32.partialorder %v1878_v60, 0.0  ;;  %vm2574_vm8 = vmmov %vm2572_vm4 }
 0x177   :  { %v758_v4 = vsub.f32 %v742_v53, %v710_v44  ;;  %vm2273_vm14 = vmand %vm2568_vm2, %vm2567_vm7  ;;  %vm2571_vm0 = vcmp.ge.f32.partialorder %v1829_v30, 3.25  ;;  %v729_v1 = vmul.f32 0.5, %v1845_v48  ;;  %v743_v31 = vsel %vm2112_vm13, %v727_v18, %v1823_v16 }
 0x178   :  { %v712_v0 = vsel %vm2571_vm0, %v1829_v30, %v696_v61  ;;  %v790_v23 = vadd.f32 %v789_v59, %v788_v50  ;;  %v684_v33 = vsel %vm2273_vm14, 0.0, %v2010_v38  ;;  %v759_v34 = vsub.f32 %v743_v31, %v711_v40  ;;  %v915_v59 = vpop.permute.xlu1 %914  ;;  %v910_v40 = vpop.permute.xlu0 %909 }
 0x179   :  { %v773_v37 = vand.u32 2147483647, %v757_v21  ;;  %v793_v43 = vsel %vm2572_vm4, %v771_v27, 0.0  ;;  %v713_v45 = vsel %vm489_vm15, %v1845_v48, %v697_v32  ;;  %v730_v6 = vmul.f32 0.5, %v1863_v7  ;;  %vm2576_vm15 = vmmov %vm2572_vm4 }
 0x17a   :  { %v744_v14 = vsel %vm2145_vm11, %v728_v47, %v1829_v30  ;;  %v792_v16 = vadd.f32 %v791_v58, %v790_v23  ;;  %vm2573_vm13 = vcmp.le.f32.partialorder %v1873_v29, 0.0  ;;  %v774_v63 = vand.u32 2147483647, %v758_v4  ;;  %vm2575_vm11 = vmmov %vm2572_vm4 }
 0x17b   :  { %v699_v49 = vsel %vm2573_vm13, %v1873_v29, %v683_v28  ;;  %v760_v38 = vsub.f32 %v744_v14, %v712_v0  ;;  %v795_v51 = vsel %vm2574_vm8, %v772_v57, 0.0  ;;  %v714_v24 = vsel %vm490_vm12, %v1863_v7, %v698_v35  ;;  %vm2577_vm12 = vmmov %vm2572_vm4 }
 0x17c   :  { %v731_v54 = vmul.f32 0.5, %v1873_v29  ;;  %v745_v52 = vsel %vm2170_vm5, %v729_v1, %v1845_v48  ;;  %v794_v30 = vadd.f32 %v793_v43, %v792_v16  ;;  %v700_v55 = vsel %vm476_vm3, %v1878_v60, %v684_v33  ;;  %v925_v58 = vpop.permute.xlu1 %924  ;;  %v920_v23 = vpop.permute.xlu0 %919 }
 0x17d   :  { %v761_v61 = vsub.f32 %v745_v52, %v713_v45  ;;  %v775_v62 = vand.u32 2147483647, %v759_v34  ;;  %v797_v11 = vsel %vm2575_vm11, %v773_v37, 0.0  ;;  %v715_v42 = vsel %vm491_vm10, %v1873_v29, %v699_v49 }
 0x17e   :  { %v732_v22 = vmul.f32 0.5, %v1878_v60  ;;  %v746_v2 = vsel %vm2195_vm1, %v730_v6, %v1863_v7  ;;  %v796_v48 = vadd.f32 %v795_v51, %v794_v30  ;;  %vm492_vm5 = vcmp.ge.f32.partialorder %v1878_v60, 3.25  ;;  %vm2578_vm1 = vmmov %vm2572_vm4 }
 0x17f   :  { %v762_v36 = vsub.f32 %v746_v2, %v714_v24  ;;  %v776_v26 = vand.u32 2147483647, %v760_v38  ;;  %v799_v3 = vsel %vm2576_vm15, %v774_v63, 0.0  ;;  %v716_v5 = vsel %vm492_vm5, %v1878_v60, %v700_v55  ;;  %vm2579_vm3 = vmmov %vm2578_vm1 }
 0x180   :  { %v747_v46 = vsel %vm2242_vm9, %v731_v54, %v1873_v29  ;;  %v798_v56 = vadd.f32 %v797_v11, %v796_v48  ;;  %v777_v12 = vand.u32 2147483647, %v761_v61  ;;  %v801_v9 = vsel %vm2577_vm12, %v775_v62, 0.0  ;;  %vm2580_vm9 = vmmov %vm2578_vm1  ;;  %v1138_v55 = vpop.permute.xlu1 %1137 }
 0x181   :  { %v763_v8 = vsub.f32 %v747_v46, %v715_v42  ;;  %v748_v7 = vsel %vm2273_vm14, %v732_v22, %v1878_v60  ;;  %v778_v32 = vand.u32 2147483647, %v762_v36  ;;  %v803_v10 = vsel %vm2578_vm1, %v776_v26, 0.0  ;;  %vm2581_vm10 = vmmov %vm2578_vm1  ;;  %v1133_v22 = vpop.permute.xlu0 %1132 }
 0x182   :  { %v800_v13 = vadd.f32 %v799_v3, %v798_v56  ;;  %v764_v39 = vsub.f32 %v748_v7, %v716_v5  ;;  %v805_v44 = vsel %vm2579_vm3, %v777_v12, 0.0  ;;  %vm2582_vm6 = vmmov %vm2578_vm1  ;;  %v1173_v20 = vlaneseq }
 0x183   :  { %v779_v17 = vand.u32 2147483647, %v763_v8  ;;  %v807_v18 = vsel %vm2580_vm9, %v778_v32, 0.0  ;;  %vm2583_vm14 = vmmov %vm2578_vm1 }
 0x184   :  { %v802_v15 = vadd.f32 %v801_v9, %v800_v13  ;;  %v780_v29 = vand.u32 2147483647, %v764_v39  ;;  %v2347_v38 = vshrl.u32 %v1173_v20, 7  ;;  %vm2584_vm13 = vmmov %vm2578_vm1 }
 0x185   :  { %v809_v25 = vsel %vm2581_vm10, %v779_v17, 0.0  ;;  %vm2585_vm9 = vmmov %vm2578_vm1 }
 0x186   :  { %v804_v41 = vadd.f32 %v803_v10, %v802_v15  ;;  %v811_v21 = vsel %vm2582_vm6, %v780_v29, 0.0  ;;  %v1148_v29 = vpop.permute.xlu1 %1147  ;;  %vm2586_vm6 = vmmov %vm2578_vm1 }
 0x188   :  { %v806_v19 = vadd.f32 %v805_v44, %v804_v41 }
 0x18a   :  { %v808_v28 = vadd.f32 %v807_v18, %v806_v19 }
 0x18c   :  { %v810_v60 = vadd.f32 %v809_v25, %v808_v28 }
 0x18e   :  { %v2332_v27 = vadd.f32 %v811_v21, %v810_v60  ;;  %v1143_v21 = vpop.permute.xlu0 %1142 }
 0x226   :  { %v1351_v47 = vpop.f32.mrb[0].mxu1 }
 0x227   :  { %v2334_v53 = vadd.f32 %v1351_v47, %v915_v59  ;;  %v993_v50 = vpop.f32.mrb[1].mxu1 }
 0x228   :  { %v2336_v35 = vadd.f32 %v993_v50, %v910_v40 }
 0x229   :  { %v1107_v4 = vmax.f32 %v2334_v53, 0.0  ;;  %v1021_v57 = vmul.f32 2.0, %v2334_v53  ;;  %vm1053_vm2 = vcmp.ge.f32.partialorder %v2334_v53, 0.0  ;;  %vm1013_vm4 = vcmp.le.f32.partialorder %v2334_v53, 0.0 }
 0x22a   :  { %v1106_v0 = vmax.f32 %v2336_v35, 0.0  ;;  %v1354_v1 = vpop.f32.mrb[2].mxu1  ;;  %v1020_v31 = vmul.f32 2.0, %v2336_v35  ;;  %vm1052_vm7 = vcmp.ge.f32.partialorder %v2336_v35, 0.0  ;;  %vm1012_vm0 = vcmp.le.f32.partialorder %v2336_v35, 0.0 }
 0x22b   :  { %v1111_v33 = vmin.f32 %v1107_v4, 3.0  ;;  %v2342_v34 = vadd.f32 %v1354_v1, %v925_v58  ;;  %v1003_v37 = vpop.f32.mrb[3].mxu1  ;;  %v1287_v14 = vadd.f32 -0.5, %v1021_v57  ;;  %vm1016_vm8 = vcmp.ge.f32.partialorder %v2336_v35, 3.25 }
 0x22c   :  { %v1110_v43 = vmin.f32 %v1106_v0, 3.0  ;;  %v2344_v45 = vadd.f32 %v1003_v37, %v920_v23  ;;  %v1286_v6 = vadd.f32 -0.5, %v1020_v31  ;;  %vm1017_vm15 = vcmp.ge.f32.partialorder %v2334_v53, 3.25 }
 0x22d   :  { %v1115_v16 = vmul.f32 2.0, %v1111_v33  ;;  %v1109_v49 = vmax.f32 %v2342_v34, 0.0  ;;  %v1023_v30 = vmul.f32 2.0, %v2342_v34  ;;  %v1291_v42 = vadd.f32 -1e-05, %v1287_v14 }
 0x22e   :  { %v1114_v63 = vmul.f32 2.0, %v1110_v43  ;;  %v1108_v51 = vmax.f32 %v2344_v45, 0.0  ;;  %v1022_v52 = vmul.f32 2.0, %v2344_v45  ;;  %v1290_v11 = vadd.f32 -1e-05, %v1286_v6 }
 0x22f   :  { %v1119_v24 = vfloor.f32 %v1115_v16  ;;  %v1113_v54 = vmin.f32 %v1109_v49, 3.0  ;;  %v1289_v26 = vadd.f32 -0.5, %v1023_v30  ;;  %v1428_v56 = vround.rtne.f32 %v1291_v42 }
 0x230   :  { %v1118_v61 = vfloor.f32 %v1114_v63  ;;  %v1112_v62 = vmin.f32 %v1108_v51, 3.0  ;;  %v1288_v36 = vadd.f32 -0.5, %v1022_v52  ;;  %v1427_v46 = vround.rtne.f32 %v1290_v11 }
 0x231   :  { %v1123_v2 = vmul.f32 0.5, %v1119_v24  ;;  %v1117_v48 = vmul.f32 2.0, %v1113_v54  ;;  %v1293_v7 = vadd.f32 -1e-05, %v1289_v26  ;;  %v1037_v10 = vmul.f32 2.0, %v1428_v56 }
 0x232   :  { %v1122_v3 = vmul.f32 0.5, %v1118_v61  ;;  %v1116_v5 = vmul.f32 2.0, %v1112_v62  ;;  %v1292_v9 = vadd.f32 -1e-05, %v1288_v36  ;;  %v1036_v32 = vmul.f32 2.0, %v1427_v46 }
 0x233   :  { %v1151_v8 = vmul.f32 %v1138_v55, %v1123_v2  ;;  %v1121_v12 = vfloor.f32 %v1117_v48  ;;  %v1430_v41 = vround.rtne.f32 %v1293_v7  ;;  %v1041_v28 = vadd.f32 1.0, %v1037_v10 }
 0x234   :  { %v1150_v13 = vmul.f32 %v1133_v22, %v1122_v3  ;;  %v1120_v39 = vfloor.f32 %v1116_v5  ;;  %v1429_v44 = vround.rtne.f32 %v1292_v9  ;;  %v1040_v25 = vadd.f32 1.0, %v1036_v32 }
 0x235   :  { %v1155_v15 = vsel %vm2583_vm14, %v1151_v8, 0.0  ;;  %v1125_v17 = vmul.f32 0.5, %v1121_v12  ;;  %vm1014_vm11 = vcmp.le.f32.partialorder %v2344_v45, 0.0  ;;  %vm1015_vm5 = vcmp.le.f32.partialorder %v2342_v34, 0.0 }
 0x236   :  { %v1154_v18 = vsel %vm2584_vm13, %v1150_v13, 0.0  ;;  %v1124_v19 = vmul.f32 0.5, %v1120_v39  ;;  %v1038_v40 = vmul.f32 2.0, %v1429_v44  ;;  %v1039_v47 = vmul.f32 2.0, %v1430_v41 }
 0x237   :  { %v1156_v60 = vadd.f32 %v1155_v15, %v1154_v18  ;;  %v1153_v59 = vmul.f32 %v1148_v29, %v1125_v17  ;;  %v1044_v4 = vmul.f32 0.5, %v1040_v25  ;;  %v1045_v57 = vmul.f32 0.5, %v1041_v28 }
 0x238   :  { %v1152_v50 = vmul.f32 %v1143_v21, %v1124_v19  ;;  %vm1054_vm3 = vcmp.ge.f32.partialorder %v2344_v45, 0.0  ;;  %v1042_v20 = vadd.f32 1.0, %v1038_v40  ;;  %v1043_v0 = vadd.f32 1.0, %v1039_v47  ;;  %v1171_v19 = vpop.permute.xlu0 %1170 }
 0x239   :  { %v1159_v58 = vsel %vm2585_vm9, %v1153_v59, 0.0  ;;  %vm1055_vm10 = vcmp.ge.f32.partialorder %v2342_v34, 0.0  ;;  %v1048_v31 = vmul.f32 0.5, %v1044_v4  ;;  %v1049_v23 = vmul.f32 0.5, %v1045_v57 }
 0x23a   :  { %v1157_v1 = vsel %vm2586_vm6, %v1152_v50, 0.0  ;;  %vm1056_vm14 = vcmp.le.f32.partialorder %v2336_v35, 0.5  ;;  %v1046_v37 = vmul.f32 0.5, %v1042_v20  ;;  %v1047_v43 = vmul.f32 0.5, %v1043_v0 }
 0x23b   :  { %v1158_v33 = vadd.f32 %v1157_v1, %v1156_v60  ;;  %vm1057_vm13 = vcmp.le.f32.partialorder %v2334_v53, 0.5  ;;  %vm2372_vm1 = vmand %vm1052_vm7, %vm1056_vm14  ;;  %vm1058_vm9 = vcmp.le.f32.partialorder %v2344_v45, 0.5  ;;  %vm1059_vm12 = vcmp.le.f32.partialorder %v2342_v34, 0.5 }
 0x23c   :  { %vm2380_vm6 = vmand %vm1053_vm2, %vm1057_vm13  ;;  %v1064_v16 = vsel %vm2372_vm1, 0.0, %v1048_v31  ;;  %v1076_v49 = vmul.f32 0.5, %v2336_v35  ;;  %v1050_v51 = vmul.f32 0.5, %v1046_v37  ;;  %v1051_v24 = vmul.f32 0.5, %v1047_v43 }
 0x23d   :  { %v1160_v63 = vadd.f32 %v1159_v58, %v1158_v33  ;;  %vm2389_vm7 = vmand %vm1054_vm3, %vm1058_vm9  ;;  %v1065_v52 = vsel %vm2380_vm6, 0.0, %v1049_v23  ;;  %v1068_v55 = vsel %vm1012_vm0, %v2336_v35, %v1064_v16  ;;  %v1077_v62 = vmul.f32 0.5, %v2334_v53 }
 0x23e   :  { %vm2397_vm2 = vmand %vm1055_vm10, %vm1059_vm12  ;;  %v1069_v61 = vsel %vm1013_vm4, %v2334_v53, %v1065_v52  ;;  %v1078_v11 = vmul.f32 0.5, %v2344_v45  ;;  %v1066_v22 = vsel %vm2389_vm7, 0.0, %v1050_v51  ;;  %v1072_v48 = vsel %vm1016_vm8, %v2336_v35, %v1068_v55 }
 0x23f   :  { %v1161_v42 = vrot.slane %v1160_v63, 4  ;;  %v1067_v2 = vsel %vm2397_vm2, 0.0, %v1051_v24  ;;  %v1070_v36 = vsel %vm1014_vm11, %v2344_v45, %v1066_v22  ;;  %v1073_v3 = vsel %vm1017_vm15, %v2334_v53, %v1069_v61 }
 0x240   :  { %v1071_v26 = vsel %vm1015_vm5, %v2342_v34, %v1067_v2  ;;  %v1079_v5 = vmul.f32 0.5, %v2342_v34  ;;  %vm2595_vm0 = vcmp.ge.f32.partialorder %v2344_v45, 3.25  ;;  %vm2596_vm4 = vcmp.ge.f32.partialorder %v2342_v34, 3.25 }
 0x241   :  { %v1162_v46 = vadd.f32 %v1161_v42, %v1160_v63  ;;  %v1074_v56 = vsel %vm2595_vm0, %v2344_v45, %v1070_v36  ;;  %v1075_v8 = vsel %vm2596_vm4, %v2342_v34, %v1071_v26  ;;  %v1080_v12 = vsel %vm2372_vm1, %v1076_v49, %v2336_v35 }
 0x242   :  { %v1081_v9 = vsel %vm2380_vm6, %v1077_v62, %v2334_v53  ;;  %v1082_v7 = vsel %vm2389_vm7, %v1078_v11, %v2344_v45  ;;  %v1083_v13 = vsel %vm2397_vm2, %v1079_v5, %v2342_v34  ;;  %v1084_v39 = vsub.f32 %v1080_v12, %v1072_v48 }
 0x243   :  { %v1163_v32 = vrot.slane %v1162_v46, 2  ;;  %v1085_v10 = vsub.f32 %v1081_v9, %v1073_v3  ;;  %v1086_v15 = vsub.f32 %v1082_v7, %v1074_v56  ;;  %v1087_v17 = vsub.f32 %v1083_v13, %v1075_v8 }
 0x244   :  { %v813_v44 = vrot.slane %v2332_v27, 4  ;;  %v1088_v35 = vand.u32 2147483647, %v1084_v39  ;;  %v1175_v41 = vsub.s32 0, %v2347_v38  ;;  %vm2597_vm8 = vcmask 64512  }
 0x245   :  { %v1164_v29 = vadd.f32 %v1163_v32, %v1162_v46  ;;  %v1089_v53 = vand.u32 2147483647, %v1085_v10  ;;  %v1090_v18 = vand.u32 2147483647, %v1086_v15  ;;  %v1091_v28 = vand.u32 2147483647, %v1087_v17  ;;  %vm2598_vm11 = vmmov %vm2597_vm8 }
 0x246   :  { %v1092_v45 = vsel %vm2597_vm8, %v1088_v35, 0.0  ;;  %vm2599_vm5 = vmmov %vm2597_vm8  ;;  %v814_v60 = vadd.f32 %v813_v44, %v2332_v27  ;;  %v1176_v40 = vrot.slane %v1171_v19, %v1175_v41  ;;  %vm1206_vm13 = vcmask 57344  }
 0x247   :  { %v1165_v25 = vrot.slane %v1164_v29, 1  ;;  %v1093_v34 = vsel %vm2598_vm11, %v1089_v53, 0.0  ;;  %v1095_v21 = vsel %vm2599_vm5, %v1090_v18, 0.0  ;;  %vm2600_vm15 = vmmov %vm2599_vm5 }
 0x248   :  { %v1094_v59 = vadd.f32 %v1093_v34, %v1092_v45  ;;  %v1097_v38 = vsel %vm2600_vm15, %v1091_v28, 0.0  ;;  %v815_v57 = vrot.slane %v814_v60, 2 }
 0x249   :  { %v1166_v47 = vadd.f32 %v1165_v25, %v1164_v29 }
 0x24a   :  { %v1096_v50 = vadd.f32 %v1095_v21, %v1094_v59  ;;  %v816_v23 = vadd.f32 %v815_v57, %v814_v60 }
 0x24b   :  { %v1177_v4 = vadd.f32 %v1176_v40, %v1166_v47 }
 0x24c   :  { %v1098_v58 = vadd.f32 %v1097_v38, %v1096_v50  ;;  %v817_v27 = vrot.slane %v816_v23, 1 }
 0x24d   :  { %v1296_v20 = vmul.f32 -1.442695, %v1177_v4  ;;  %v1180_v0 = vmul.f32 2.0, %v1177_v4  ;;  %vm1188_vm12 = vcmp.ge.f32.partialorder %v1177_v4, 0.0  ;;  %vm1189_vm1 = vcmp.le.f32.partialorder %v1177_v4, 0.5 }
 0x24e   :  { %v1099_v1 = vrot.slane %v1098_v58, 4  ;;  %v818_v51 = vadd.f32 %v817_v27, %v816_v23  ;;  %v1194_v62 = vmul.f32 0.5, %v1177_v4  ;;  %vm1190_vm3 = vmand %vm1188_vm12, %vm1189_vm1  ;;  %vm1178_vm10 = vcmp.le.f32.partialorder %v1177_v4, 0.0 }
 0x24f   :  { %1439 = vpow2.f32 %v1296_v20  ;;  %v1294_v31 = vadd.f32 -0.5, %v1180_v0  ;;  %vm1179_vm14 = vcmp.ge.f32.partialorder %v1177_v4, 3.25 }
 0x250   :  { %v1100_v33 = vadd.f32 %v1099_v1, %v1098_v58  ;;  %v1195_v2 = vsel %vm1190_vm3, %v1194_v62, %v1177_v4 }
 0x251   :  { %v1295_v37 = vadd.f32 -1e-05, %v1294_v31 }
 0x252   :  { %v1101_v43 = vrot.slane %v1100_v33, 2 }
 0x253   :  { %v1431_v6 = vround.rtne.f32 %v1295_v37 }
 0x254   :  { %v1102_v14 = vadd.f32 %v1101_v43, %v1100_v33 }
 0x255   :  { %v1184_v16 = vmul.f32 2.0, %v1431_v6 }
 0x256   :  { %v1103_v49 = vrot.slane %v1102_v14, 1 }
 0x257   :  { %v1185_v63 = vadd.f32 1.0, %v1184_v16 }
 0x258   :  { %v1104_v24 = vadd.f32 %v1103_v49, %v1102_v14 }
 0x259   :  { %v1440_v54 = vpop.eup %1439  ;;  %v1186_v52 = vmul.f32 0.5, %v1185_v63 }
 0x25a   :  { %v1203_v30 = vadd.f32 1.0, %v1440_v54  ;;  %v1105_v55 = vadd.f32 %v1104_v24, %v818_v51 }
 0x25b   :  { %v1187_v61 = vmul.f32 0.5, %v1186_v52 }
 0x25c   :  { %1441 = vrcp.f32 %v1203_v30 }
 0x25d   :  { %v1191_v11 = vsel %vm1190_vm3, 0.0, %v1187_v61 }
 0x25e   :  { %v1192_v42 = vsel %vm1178_vm10, %v1177_v4, %v1191_v11 }
 0x25f   :  { %v1193_v22 = vsel %vm1179_vm14, %v1177_v4, %v1192_v42 }
 0x260   :  { %v1196_v48 = vsub.f32 %v1195_v2, %v1193_v22 }
 0x262   :  { %v1197_v36 = vand.u32 2147483647, %v1196_v48 }
 0x264   :  { %v1199_v26 = vadd.f32 %v1197_v36, %v1105_v55 }
 0x266   :  { %v1442_v3 = vpop.eup %1441  ;;  %1208 = vst.msk [vmem:[#allocation5] sm:$0x1] %vm1206_vm13, %v1199_v26 }
 0x267   :  { %1207 = vst.msk [vmem:[#allocation3] sm:$0x1] %vm1206_vm13, %v1442_v3 }
 0x268   :  { %1454 = shalt.err (!%p1451_p4)
}
 0x269   :  { %s1455_s15 = scalar_lea.hbm %s2491_s8, 16 }
 0x26a   :  { %p1456_p5 = scmp.ne.s32.totalorder %s2491_s8, %s1455_s15  ;;  %p1459_p6 = scmp.lt.u32.totalorder %s1455_s15, %s2491_s8 }
 0x26c   :  { %p1461_p7 = pnand %p1459_p6, %p1456_p5 }
 0x26e   :  { %1464 = shalt.err (!%p1461_p7)
}
 0x26f   :  { %1228 = dma.vmem_to_hbm [thread:$0]  %s1226_s10, 16, %s2491_s8, [#allocation6]  }
 0x270   :  { %s1465_s21 = scalar_lea.vmem %s2451_s12, 16  ;;  %s1469_s22 = scalar_lea.vmem %s2451_s12, 32 }
 0x271   :  { %p1466_p8 = scmp.ne.s32.totalorder %s2451_s12, %s1465_s21  ;;  %p1470_p9 = scmp.lt.s32.totalorder %s2451_s12, %s2451_s12 }
 0x272   :  { %p1471_p10 = scmp.lt.s32.totalorder %s1469_s22, %s1465_s21 }
 0x274   :  { %p1472_p11 = por %p1471_p10, %p1470_p9 }
 0x276   :  { %p1473_p12 = pnand %p1472_p11, %p1466_p8 }
 0x278   :  { %1476 = shalt.err (!%p1473_p12)
}
 0x279   :  { %s1477_s23 = scalar_lea.hbm %s2490_s7, 16 }
 0x27a   :  { %p1478_p13 = scmp.ne.s32.totalorder %s2490_s7, %s1477_s23  ;;  %p1481_p0 = scmp.lt.u32.totalorder %s1477_s23, %s2490_s7 }
 0x27c   :  { %p1483_p1 = pnand %p1481_p0, %p1478_p13 }
 0x27e   :  { %1486 = shalt.err (!%p1483_p1)
}
 0x27f   :  { %1218 = dma.vmem_to_hbm [thread:$0]  %s2451_s12, 16, %s2490_s7, [#allocation4]  }
 0x280   :  { %1487 = dma.done.wait [#allocation4], 16  }
 0x281   :  { %1488 = vsyncadd [#allocation4], 4294967280 }
 0x282   :  { %1489 = dma.done.wait [#allocation6], 16  }
 0x283   :  { %1490 = vsyncadd [#allocation6], 4294967280 }
 0x284   :  { %1235 = vsyncpa [#allocation4], 1 }
 0x285   :  { %1236 = vsyncpa [#allocation6], 1 }

</bundles_post_ra>
